<compile_context>
chip_gen: v7x
topology: tpu7x:2x2x1
jax: 0.10.0
libtpu: 0.0.40
codegen_flags: <defaults>
</compile_context>

<pallas_src>
import math
from functools import partial

import jax
import jax.numpy as jnp
from jax import lax
from jax.experimental import pallas as pl
from jax.experimental.pallas import tpu as pltpu

LANE = 128   # TPU lane width: every feature dim is zero-padded to this
SUB = 8      # sublane granularity: per-batch surround rows padded to this


def _leaky_relu(x, slope=0.01):
    # nn.LeakyReLU(0.01) as a single VALU max instead of compare+select.
    return jnp.maximum(x, slope * x)


def _round_up(n, m):
    return ((n + m - 1) // m) * m


def v2p_finetuner_kernel(xsur_ref, xpre_ref, wf_ref, ws_ref, b_ref, out_ref,
                         *, bb, m_pad, m_real):
    """One batch block of the forward pass on lane-dense VMEM tiles.

    xsur_ref : (bb*m_pad, 128) bf16  surround points; offsets already tanh'ed
    xpre_ref : (bb, 256)       f32   [pre (pad to 128) | pre_pre (pad to 128)]
    wf_ref   : (128, 256)      bf16  block-diag [w_in | w_off]   (pinned)
    ws_ref   : (128, 512)      bf16  [w_t1 | w_t2 | w_o1 | w_o2] (pinned)
    b_ref    : (8, 128)        f32   rows 0..3: b_in, b_t1, b_t2, b_o1 (pinned)
    out_ref  : (bb, 128)       f32   real channels in [:, :out_channels]
    """
    f32, bf16 = jnp.float32, jnp.bfloat16

    xs = xsur_ref[...]                                        # (rows, 128) bf16
    wf = wf_ref[...]                                          # (128, 256) bf16
    ws = ws_ref[...]                                          # (128, 512) bf16
    b = b_ref[...]                                            # (8, 128)  f32

    # Fused block-diagonal input projection:
    #   z[:, :128] = feat         @ w_in   (padded)
    #   z[:, 128:] = tanh(off)    @ w_off  (padded)
    z = jnp.dot(xs, wf, preferred_element_type=f32)           # (rows, 256) f32
    g = _leaky_relu(z[:, :LANE] + b[0:1, :]) * jnp.tanh(z[:, LANE:])

    # out_finetune_mlp_tune: 2x (Linear(C,C) + LeakyReLU)
    h = _leaky_relu(jnp.dot(g.astype(bf16), ws[:, 0:LANE],
                            preferred_element_type=f32) + b[1:2, :])
    h = _leaky_relu(jnp.dot(h.astype(bf16), ws[:, LANE:2 * LANE],
                            preferred_element_type=f32) + b[2:3, :])

    # Per-batch max over the REAL surround rows: one masked sublane reduce.
    # Padded rows are nonzero after the biased layers, so mask them to -inf.
    h3 = h.reshape(bb, m_pad, LANE)
    row = lax.broadcasted_iota(jnp.int32, (bb, m_pad, LANE), 1)
    h3 = jnp.where(row < m_real, h3, -jnp.inf)
    tmp = jnp.max(h3, axis=1)                                 # (bb, 128)

    xp = xpre_ref[...]                                        # (bb, 256) f32
    t = tmp + xp[:, :LANE]                                    # + pre

    # out_finetune_mlp_out: Linear(C,C)+LeakyReLU, Linear(C,out,no bias)
    t = _leaky_relu(jnp.dot(t.astype(bf16), ws[:, 2 * LANE:3 * LANE],
                            preferred_element_type=f32) + b[3:4, :])
    out_ref[...] = (jnp.dot(t.astype(bf16), ws[:, 3 * LANE:],
                            preferred_element_type=f32) + xp[:, LANE:])


def init_params(key, n_class, f_channels, out_channels):
    """Synthetic parameters (torch-default-like scaling), stored as (in, out)."""
    C = f_channels
    ks = jax.random.split(key, 10)

    def w(k, fan_in, fan_out):
        bnd = 1.0 / math.sqrt(fan_in)
        return jax.random.uniform(k, (fan_in, fan_out), jnp.float32, -bnd, bnd)

    def bias(k, fan_in, fan_out):
        bnd = 1.0 / math.sqrt(fan_in)
        return jax.random.uniform(k, (1, fan_out), jnp.float32, -bnd, bnd)

    return dict(
        w_off=w(ks[0], 3, C),                    # Linear(3, C, bias=False)
        w_in=w(ks[1], n_class, C), b_in=bias(ks[2], n_class, C),
        w_t1=w(ks[3], C, C), b_t1=bias(ks[4], C, C),
        w_t2=w(ks[5], C, C), b_t2=bias(ks[6], C, C),
        w_o1=w(ks[7], C, C), b_o1=bias(ks[8], C, C),
        w_o2=w(ks[9], C, out_channels),          # Linear(C, out, bias=False)
    )


def pack_params(params, *, n_class, f_channels, out_channels):
    """Zero-pad & consolidate the 10 torch parameters into 3 lane-dense slabs."""
    C = f_channels
    wf = jnp.zeros((LANE, 2 * LANE), jnp.float32)
    wf = wf.at[:n_class, :C].set(params["w_in"])
    wf = wf.at[n_class:n_class + 3, LANE:LANE + C].set(params["w_off"])

    ws = jnp.zeros((LANE, 4 * LANE), jnp.float32)
    ws = ws.at[:C, 0 * LANE:0 * LANE + C].set(params["w_t1"])
    ws = ws.at[:C, 1 * LANE:1 * LANE + C].set(params["w_t2"])
    ws = ws.at[:C, 2 * LANE:2 * LANE + C].set(params["w_o1"])
    ws = ws.at[:C, 3 * LANE:3 * LANE + out_channels].set(params["w_o2"])

    bs = jnp.zeros((SUB, LANE), jnp.float32)                  # sublane-padded
    bs = bs.at[0, :C].set(params["b_in"][0])
    bs = bs.at[1, :C].set(params["b_t1"][0])
    bs = bs.at[2, :C].set(params["b_t2"][0])
    bs = bs.at[3, :C].set(params["b_o1"][0])

    return dict(w_fused=wf.astype(jnp.bfloat16),
                w_slab=ws.astype(jnp.bfloat16),
                b_slab=bs)


@partial(jax.jit, static_argnames=("n_class", "f_channels", "out_channels",
                                   "block_rows"))
def v2p_finetuner_forward(x, x_sur, d, packed, *, n_class, f_channels,
                          out_channels, block_rows=512):
    del d                                    # unused in the reference forward()
    B, M, kin = x_sur.shape
    assert kin == n_class + 3
    assert x.shape == (B, n_class + f_channels)
    assert out_channels == n_class, "final `+ pre_pre` needs out_channels == n_class"
    assert max(n_class + 3, f_channels, out_channels) <= LANE

    m_pad = _round_up(M, SUB)

    # ---- batch-block / grid sizing (>=~block_rows surround rows per step) ----
    bb = max(1, block_rows // m_pad)
    if bb < B:
        bb = _round_up(bb, SUB)              # sublane-aligned batch block
    bb = min(bb, B)                          # single-step path: block == array
    b_pad = _round_up(B, bb)
    n_steps = b_pad // bb
    rows = bb * m_pad

    # ---- surround slab: tanh(f32) -> concat -> bf16 -> pad, all in ONE pass ----
    off_t = jnp.tanh(x_sur[:, :, n_class:])                   # f32 tanh, then cast
    xs = jnp.concatenate([x_sur[:, :, :n_class], off_t],
                         axis=-1).astype(jnp.bfloat16)        # (B, M, kin) bf16
    xs = jnp.pad(xs, ((0, b_pad - B), (0, m_pad - M), (0, LANE - kin)))
    xs = xs.reshape(b_pad * m_pad, LANE)

    # ---- pre / pre_pre packed lane-dense side by side: (b_pad, 256) f32 ----
    xp = jnp.zeros((b_pad, 2 * LANE), jnp.float32)
    xp = xp.at[:B, :f_channels].set(x[:, n_class:])            # pre
    xp = xp.at[:B, LANE:LANE + n_class].set(x[:, :n_class])    # pre_pre

    kern = partial(v2p_finetuner_kernel, bb=bb, m_pad=m_pad, m_real=M)

    rows_total = b_pad * m_pad
    cost = pl.CostEstimate(
        flops=(2 * rows_total * LANE * 2 * LANE          # fused input projection
               + 2 * 2 * rows_total * LANE * LANE        # two tune layers
               + 2 * 2 * b_pad * LANE * LANE),           # two output layers
        transcendentals=rows_total * LANE,               # in-kernel gate tanh
        bytes_accessed=(xs.size * 2 + xp.size * 4 + b_pad * LANE * 4
                        + packed["w_fused"].size * 2
                        + packed["w_slab"].size * 2
                        + packed["b_slab"].size * 4),
    )

    out = pl.pallas_call(
        kern,
        out_shape=jax.ShapeDtypeStruct((b_pad, LANE), jnp.float32),
        grid=(n_steps,),
        in_specs=[
            pl.BlockSpec((rows, LANE), lambda i: (i, 0)),          # surround block
            pl.BlockSpec((bb, 2 * LANE), lambda i: (i, 0)),        # pre/pre_pre
            pl.BlockSpec((LANE, 2 * LANE), lambda i: (0, 0)),      # fused W (pinned)
            pl.BlockSpec((LANE, 4 * LANE), lambda i: (0, 0)),      # W slab  (pinned)
            pl.BlockSpec((SUB, LANE), lambda i: (0, 0)),           # biases  (pinned)
        ],
        out_specs=pl.BlockSpec((bb, LANE), lambda i: (i, 0)),
        compiler_params=pltpu.CompilerParams(
            dimension_semantics=("parallel",),
            vmem_limit_bytes=32 * 1024 * 1024),
        cost_estimate=cost,
    )(xs, xp, packed["w_fused"], packed["w_slab"], packed["b_slab"])

    # lane-dense (b_pad, 128) kernel output; real values in [:B, :out_channels]
    return out[:B, :out_channels]


def v2p_finetuner_reference(x, x_sur, d, params, n_class):
    """Pure-JAX reference of V2PFinetuner_v5_2.forward with the same bf16
    matmul / f32-accumulate precision the kernel uses."""
    del d
    bf16, f32 = jnp.bfloat16, jnp.float32

    def mm(a, w):
        return jnp.einsum("...k,kn->...n", a.astype(bf16), w.astype(bf16),
                          preferred_element_type=f32)

    pre = x[:, n_class:]
    pre_pre = x[:, :n_class]
    feat_sur = x_sur[:, :, :n_class]
    off_sur = x_sur[:, :, n_class:]

    off_w = jnp.tanh(off_sur)                 # torch split/cat is a no-op
    tmp_in = _leaky_relu(mm(feat_sur, params["w_in"]) + params["b_in"])
    off_e = jnp.tanh(mm(off_w, params["w_off"]))
    h = tmp_in * off_e
    h = _leaky_relu(mm(h, params["w_t1"]) + params["b_t1"])
    h = _leaky_relu(mm(h, params["w_t2"]) + params["b_t2"])
    tmp = jnp.max(h, axis=1) + pre
    t = _leaky_relu(mm(tmp, params["w_o1"]) + params["b_o1"])
    return mm(t, params["w_o2"]) + pre_pre


if __name__ == "__main__":
    # Small shapes consistent with the module (out_channels == n_class required
    # by the final `+ pre_pre`). B=24 with block_rows=256 exercises a 2-step
    # grid (bb=16, b_pad=32) including batch padding and the masked max.
    n_class = 26
    f_channels = 32       # main_channel
    out_channels = 26
    B, M = 24, 12         # batch, surrounding points per batch element

    key = jax.random.PRNGKey(0)
    k_x, k_sur, k_d, k_p = jax.random.split(key, 4)

    x = jax.random.normal(k_x, (B, n_class + f_channels), jnp.float32)
    x_sur = jax.random.normal(k_sur, (B, M, n_class + 3), jnp.float32)
    d = jax.random.normal(k_d, (B, M), jnp.float32)     # unused by forward()

    params = init_params(k_p, n_class, f_channels, out_channels)
    packed = pack_params(params, n_class=n_class, f_channels=f_channels,
                         out_channels=out_channels)

    out = v2p_finetuner_forward(x, x_sur, d, packed, n_class=n_class,
                                f_channels=f_channels,
                                out_channels=out_channels, block_rows=256)
    out = jax.block_until_ready(out)

    ref = v2p_finetuner_reference(x, x_sur, d, params, n_class)
    assert out.shape == (B, out_channels), out.shape
    err = float(jnp.max(jnp.abs(out - ref)))
    assert jnp.allclose(out, ref, atol=1e-2, rtol=1e-2), err
    print("KERNEL_OK")
</pallas_src>

<mosaic_0001>
module attributes {stable_mosaic.version = 11 : i64} {
  func.func @v2p_finetuner_kernel(%arg0: i32, %arg1: memref<256x128xbf16, #tpu.memory_space<vmem>>, %arg2: memref<16x256xf32, #tpu.memory_space<vmem>>, %arg3: memref<128x256xbf16, #tpu.memory_space<vmem>>, %arg4: memref<128x512xbf16, #tpu.memory_space<vmem>>, %arg5: memref<8x128xf32, #tpu.memory_space<vmem>>, %arg6: memref<16x128xf32, #tpu.memory_space<vmem>>) attributes {dimension_semantics = [#tpu.dimension_semantics<parallel>], iteration_bounds = array<i64: 2>, scalar_prefetch = 0 : i64, scratch_operands = 0 : i64, tpu.core_type = #tpu.core_type<tc>, window_params = [{transform_indices = @transform_0, window_bounds = array<i64: 256, 128>}, {transform_indices = @transform_1, window_bounds = array<i64: 16, 256>}, {pipeline_mode = #tpu.pipeline_mode<synchronous>, transform_indices = @transform_2, window_bounds = array<i64: 128, 256>}, {pipeline_mode = #tpu.pipeline_mode<synchronous>, transform_indices = @transform_3, window_bounds = array<i64: 128, 512>}, {pipeline_mode = #tpu.pipeline_mode<synchronous>, transform_indices = @transform_4, window_bounds = array<i64: 8, 128>}, {transform_indices = @transform_5, window_bounds = array<i64: 16, 128>}]} {
    %c0 = arith.constant 0 : index
    %c0_0 = arith.constant 0 : index
    %0 = vector.load %arg1[%c0, %c0_0] : memref<256x128xbf16, #tpu.memory_space<vmem>>, vector<256x128xbf16>
    %c0_1 = arith.constant 0 : index
    %c0_2 = arith.constant 0 : index
    %1 = vector.load %arg3[%c0_1, %c0_2] : memref<128x256xbf16, #tpu.memory_space<vmem>>, vector<128x256xbf16>
    %c0_3 = arith.constant 0 : index
    %c0_4 = arith.constant 0 : index
    %2 = vector.load %arg4[%c0_3, %c0_4] : memref<128x512xbf16, #tpu.memory_space<vmem>>, vector<128x512xbf16>
    %c0_5 = arith.constant 0 : index
    %c0_6 = arith.constant 0 : index
    %3 = vector.load %arg5[%c0_5, %c0_6] : memref<8x128xf32, #tpu.memory_space<vmem>>, vector<8x128xf32>
    %cst = arith.constant dense<0.000000e+00> : vector<256x256xf32>
    %4 = tpu.matmul %0, %1, %cst {dimension_numbers = #tpu.dot_dimension_numbers<[1], [0], [0], [1], [0, 0, 1, 1], [], []>} : vector<256x128xbf16>, vector<128x256xbf16>, vector<256x256xf32> -> vector<256x256xf32>
    %5 = vector.extract_strided_slice %4 {offsets = [0, 0], sizes = [256, 128], strides = [1, 1]} : vector<256x256xf32> to vector<256x128xf32>
    %6 = vector.extract_strided_slice %3 {offsets = [0, 0], sizes = [1, 128], strides = [1, 1]} : vector<8x128xf32> to vector<1x128xf32>
    %7 = vector.broadcast %6 : vector<1x128xf32> to vector<256x128xf32>
    %8 = arith.addf %5, %7 : vector<256x128xf32>
    %cst_7 = arith.constant 0.00999999977 : f32
    %9 = vector.broadcast %cst_7 : f32 to vector<256x128xf32>
    %10 = arith.mulf %9, %8 : vector<256x128xf32>
    %11 = arith.maximumf %8, %10 : vector<256x128xf32>
    %12 = vector.extract_strided_slice %4 {offsets = [0, 128], sizes = [256, 128], strides = [1, 1]} : vector<256x256xf32> to vector<256x128xf32>
    %13 = math.tanh %12 : vector<256x128xf32>
    %14 = arith.mulf %11, %13 : vector<256x128xf32>
    %15 = arith.truncf %14 : vector<256x128xf32> to vector<256x128xbf16>
    %16 = vector.extract_strided_slice %2 {offsets = [0, 0], sizes = [128, 128], strides = [1, 1]} : vector<128x512xbf16> to vector<128x128xbf16>
    %cst_8 = arith.constant dense<0.000000e+00> : vector<256x128xf32>
    %17 = tpu.matmul %15, %16, %cst_8 {dimension_numbers = #tpu.dot_dimension_numbers<[1], [0], [0], [1], [0, 0, 1, 1], [], []>} : vector<256x128xbf16>, vector<128x128xbf16>, vector<256x128xf32> -> vector<256x128xf32>
    %18 = vector.extract_strided_slice %3 {offsets = [1, 0], sizes = [1, 128], strides = [1, 1]} : vector<8x128xf32> to vector<1x128xf32>
    %19 = vector.broadcast %18 : vector<1x128xf32> to vector<256x128xf32>
    %20 = arith.addf %17, %19 : vector<256x128xf32>
    %cst_9 = arith.constant 0.00999999977 : f32
    %21 = vector.broadcast %cst_9 : f32 to vector<256x128xf32>
    %22 = arith.mulf %21, %20 : vector<256x128xf32>
    %23 = arith.maximumf %20, %22 : vector<256x128xf32>
    %24 = arith.truncf %23 : vector<256x128xf32> to vector<256x128xbf16>
    %25 = vector.extract_strided_slice %2 {offsets = [0, 128], sizes = [128, 128], strides = [1, 1]} : vector<128x512xbf16> to vector<128x128xbf16>
    %cst_10 = arith.constant dense<0.000000e+00> : vector<256x128xf32>
    %26 = tpu.matmul %24, %25, %cst_10 {dimension_numbers = #tpu.dot_dimension_numbers<[1], [0], [0], [1], [0, 0, 1, 1], [], []>} : vector<256x128xbf16>, vector<128x128xbf16>, vector<256x128xf32> -> vector<256x128xf32>
    %27 = vector.extract_strided_slice %3 {offsets = [2, 0], sizes = [1, 128], strides = [1, 1]} : vector<8x128xf32> to vector<1x128xf32>
    %28 = vector.broadcast %27 : vector<1x128xf32> to vector<256x128xf32>
    %29 = arith.addf %26, %28 : vector<256x128xf32>
    %cst_11 = arith.constant 0.00999999977 : f32
    %30 = vector.broadcast %cst_11 : f32 to vector<256x128xf32>
    %31 = arith.mulf %30, %29 : vector<256x128xf32>
    %32 = arith.maximumf %29, %31 : vector<256x128xf32>
    %33 = vector.shape_cast %32 : vector<256x128xf32> to vector<16x16x128xf32>
    %34 = tpu.iota {dimensions = array<i32: 1>} : vector<16x16x128xi32>
    %c12_i32 = arith.constant 12 : i32
    %35 = vector.broadcast %c12_i32 : i32 to vector<16x16x128xi32>
    %36 = arith.cmpi slt, %34, %35 : vector<16x16x128xi32>
    %cst_12 = arith.constant 0xFF800000 : f32
    %37 = vector.broadcast %cst_12 : f32 to vector<16x16x128xf32>
    %38 = arith.select %36, %33, %37 : vector<16x16x128xi1>, vector<16x16x128xf32>
    %cst_13 = arith.constant dense<0xFF800000> : vector<16x128xf32>
    %39 = vector.multi_reduction <maximumf>, %38, %cst_13 [1] : vector<16x16x128xf32> to vector<16x128xf32>
    %c0_14 = arith.constant 0 : index
    %c0_15 = arith.constant 0 : index
    %40 = vector.load %arg2[%c0_14, %c0_15] : memref<16x256xf32, #tpu.memory_space<vmem>>, vector<16x256xf32>
    %41 = vector.extract_strided_slice %40 {offsets = [0, 0], sizes = [16, 128], strides = [1, 1]} : vector<16x256xf32> to vector<16x128xf32>
    %42 = arith.addf %39, %41 : vector<16x128xf32>
    %43 = arith.truncf %42 : vector<16x128xf32> to vector<16x128xbf16>
    %44 = vector.extract_strided_slice %2 {offsets = [0, 256], sizes = [128, 128], strides = [1, 1]} : vector<128x512xbf16> to vector<128x128xbf16>
    %cst_16 = arith.constant dense<0.000000e+00> : vector<16x128xf32>
    %45 = tpu.matmul %43, %44, %cst_16 {dimension_numbers = #tpu.dot_dimension_numbers<[1], [0], [0], [1], [0, 0, 1, 1], [], []>} : vector<16x128xbf16>, vector<128x128xbf16>, vector<16x128xf32> -> vector<16x128xf32>
    %46 = vector.extract_strided_slice %3 {offsets = [3, 0], sizes = [1, 128], strides = [1, 1]} : vector<8x128xf32> to vector<1x128xf32>
    %47 = vector.broadcast %46 : vector<1x128xf32> to vector<16x128xf32>
    %48 = arith.addf %45, %47 : vector<16x128xf32>
    %cst_17 = arith.constant 0.00999999977 : f32
    %49 = vector.broadcast %cst_17 : f32 to vector<16x128xf32>
    %50 = arith.mulf %49, %48 : vector<16x128xf32>
    %51 = arith.maximumf %48, %50 : vector<16x128xf32>
    %52 = arith.truncf %51 : vector<16x128xf32> to vector<16x128xbf16>
    %53 = vector.extract_strided_slice %2 {offsets = [0, 384], sizes = [128, 128], strides = [1, 1]} : vector<128x512xbf16> to vector<128x128xbf16>
    %cst_18 = arith.constant dense<0.000000e+00> : vector<16x128xf32>
    %54 = tpu.matmul %52, %53, %cst_18 {dimension_numbers = #tpu.dot_dimension_numbers<[1], [0], [0], [1], [0, 0, 1, 1], [], []>} : vector<16x128xbf16>, vector<128x128xbf16>, vector<16x128xf32> -> vector<16x128xf32>
    %55 = vector.extract_strided_slice %40 {offsets = [0, 128], sizes = [16, 128], strides = [1, 1]} : vector<16x256xf32> to vector<16x128xf32>
    %56 = arith.addf %54, %55 : vector<16x128xf32>
    %c0_19 = arith.constant 0 : index
    %c0_20 = arith.constant 0 : index
    %57 = vector.load %arg6[%c0_19, %c0_20] : memref<16x128xf32, #tpu.memory_space<vmem>>, vector<16x128xf32>
    tpu.vector_store %arg6[%c0_19, %c0_20], %56 {strides = array<i32>} : memref<16x128xf32, #tpu.memory_space<vmem>>, vector<16x128xf32>,
    return
  }
  func.func @transform_0(%arg0: i32) -> (i32, i32) {
    %c0_i32 = arith.constant 0 : i32
    %c0_i32_0 = arith.constant 0 : i32
    return %arg0, %c0_i32 : i32, i32
  }
  func.func @transform_1(%arg0: i32) -> (i32, i32) {
    %c0_i32 = arith.constant 0 : i32
    %c0_i32_0 = arith.constant 0 : i32
    return %arg0, %c0_i32 : i32, i32
  }
  func.func @transform_2(%arg0: i32) -> (i32, i32) {
    %c0_i32 = arith.constant 0 : i32
    %c0_i32_0 = arith.constant 0 : i32
    %c0_i32_1 = arith.constant 0 : i32
    return %c0_i32, %c0_i32_0 : i32, i32
  }
  func.func @transform_3(%arg0: i32) -> (i32, i32) {
    %c0_i32 = arith.constant 0 : i32
    %c0_i32_0 = arith.constant 0 : i32
    %c0_i32_1 = arith.constant 0 : i32
    return %c0_i32, %c0_i32_0 : i32, i32
  }
  func.func @transform_4(%arg0: i32) -> (i32, i32) {
    %c0_i32 = arith.constant 0 : i32
    %c0_i32_0 = arith.constant 0 : i32
    %c0_i32_1 = arith.constant 0 : i32
    return %c0_i32, %c0_i32_0 : i32, i32
  }
  func.func @transform_5(%arg0: i32) -> (i32, i32) {
    %c0_i32 = arith.constant 0 : i32
    %c0_i32_0 = arith.constant 0 : i32
    return %arg0, %c0_i32 : i32, i32
  }
}

</mosaic_0001>

<bundles_post_ra>
// kernel: v2p_finetuner_forward.1
= control target key start
LH: loop header
LB: loop body
LE: loop exit
PB: predicated region body
PF: predicated region fallthrough
CT: control target
= control target key end

     0   :  { %s2451_s18 = smov 0   ;;  %s2877_s0 = inlined_call_operand.vmem [shape: bf16[512,128], index: 0, kind: input, shape index: {}]   ;;  %s2878_s1 = inlined_call_operand.vmem [shape: f32[32,256], index: 1, kind: input, shape index: {}]   ;;  %s2879_s2 = inlined_call_operand.vmem [shape: bf16[128,256], index: 2, kind: input, shape index: {}]   ;;  %s2880_s3 = inlined_call_operand.vmem [shape: bf16[128,512], index: 3, kind: input, shape index: {}]   ;;  %s2881_s4 = inlined_call_operand.vmem [shape: f32[8,128], index: 4, kind: input, shape index: {}]   ;;  %s2882_s5 = inlined_call_operand.vmem [shape: f32[32,128], index: 5, kind: output, shape index: {}]  }
   0x1 LB: > { %s1965_s19 = sadd.s32 4294967295, %s2416_s18   ;;  %p1969_p0 = scmp.ge.s32.totalorder %s2416_s18, 1  ;;  %s2416_s18 = sphi %s2451_s18, %s15_s18  }
   0x2   : > { %p200_p1 = scmp.lt.s32.totalorder %s2416_s18, 3 }
   0x4   : > { %p201_p2 = pnand %p1969_p0, %p200_p1 }
   0x5   : > { %v2257_v0 = vld [vmem:[%s2879_s2 + $0x4] ss:$8 sps:$4 sm:$0xff] (!%p201_p2)   ;;  %s1970_s22 = sshll.u32 (!%p201_p2), %s1965_s19, 5  ;;  %v2259_v1 = vld [vmem:[%s2879_s2] ss:$8 sps:$4 sm:$0xff] (!%p201_p2)   ;;  %v2418_v2 = vmov (!%p201_p2), 0   ;;  %v704_v42 = vlaneseq (!%p201_p2) }
   0x6   : > { %204 = sbr.rel (%p201_p2) target bundleno = 1299 (0x513), region = 40  ;;  %543 = vmatprep.mubr.bf16.mxu0 (!%p201_p2), %v2418_v2  ;;  %p235_p3 = scmp.lt.s32.totalorder (!%p201_p2), %s1970_s22, 63  ;;  %511 = vmatprep.subr.bf16.mxu0 (!%p201_p2), %v2257_v0  ;;  %v2260_v3 = vld [vmem:[%s2879_s2 + $0x14] ss:$8 sps:$4 sm:$0xff] (!%p201_p2)   ;;  %v2262_v4 = vld [vmem:[%s2879_s2 + $0x10] ss:$8 sps:$4 sm:$0xff] (!%p201_p2)  }
   0x7   : > { %512 = vmatpush1.bf16.msra.mxu0 (!%p201_p2), %v2259_v1  ;;  %v2263_v5 = vld [vmem:[%s2879_s2 + $0x24] ss:$8 sps:$4 sm:$0xff] (!%p201_p2)   ;;  %v2265_v6 = vld [vmem:[%s2879_s2 + $0x20] ss:$8 sps:$4 sm:$0xff] (!%p201_p2)   ;;  %v2266_v7 = vld [vmem:[%s2879_s2 + $0x34] ss:$8 sps:$4 sm:$0xff] (!%p201_p2)  }
   0x8   : > { %513 = vmatprep.subr.bf16.mxu0 (!%p201_p2), %v2260_v3  ;;  %v2268_v8 = vld [vmem:[%s2879_s2 + $0x30] ss:$8 sps:$4 sm:$0xff] (!%p201_p2)   ;;  %v2269_v9 = vld [vmem:[%s2879_s2 + $0x44] ss:$8 sps:$4 sm:$0xff] (!%p201_p2)   ;;  %v2271_v10 = vld [vmem:[%s2879_s2 + $0x40] ss:$8 sps:$4 sm:$0xff] (!%p201_p2)  }
   0x9   : > { %v2272_v11 = vld [vmem:[%s2879_s2 + $0x54] ss:$8 sps:$4 sm:$0xff] (!%p201_p2)   ;;  %v2274_v12 = vld [vmem:[%s2879_s2 + $0x50] ss:$8 sps:$4 sm:$0xff] (!%p201_p2)   ;;  %v2275_v13 = vld [vmem:[%s2879_s2 + $0x64] ss:$8 sps:$4 sm:$0xff] (!%p201_p2)  }
   0xa   : > { %v2277_v14 = vld [vmem:[%s2879_s2 + $0x60] ss:$8 sps:$4 sm:$0xff] (!%p201_p2)   ;;  %v2278_v15 = vld [vmem:[%s2879_s2 + $0x74] ss:$8 sps:$4 sm:$0xff] (!%p201_p2)   ;;  %v2280_v16 = vld [vmem:[%s2879_s2 + $0x70] ss:$8 sps:$4 sm:$0xff] (!%p201_p2)  }
   0xb   : > { %514 = vmatpush1.bf16.msra.mxu0 (!%p201_p2), %v2262_v4  ;;  %v2297_v17 = vld [vmem:[%s2880_s3] ss:$16 sps:$4 sm:$0xff] (!%p201_p2)   ;;  %v2566_v38 = vld [vmem:[%s2880_s3 + $0x4] ss:$16 sps:$4 sm:$0xff] (!%p201_p2)   ;;  %v2576_v43 = vshrl.u32 (!%p201_p2), %v704_v42, 7  ;;  %s1972_s7 = sshll.u32 (!%p201_p2), %s1965_s19, 1 }
   0xc   : > { %515 = vmatprep.subr.bf16.mxu0 (!%p201_p2), %v2263_v5  ;;  %v2300_v18 = vld [vmem:[%s2880_s3 + $0x20] ss:$16 sps:$4 sm:$0xff] (!%p201_p2)   ;;  %2110 = vmatprep.subr.bf16.mxu1 (!%p201_p2), %v2297_v17  ;;  %p241_p4 = scmp.lt.s32.totalorder (!%p201_p2), %s1972_s7, 3  ;;  %vm2420_vm1 = vmmov (!%p201_p2), 0   ;;  %vm1692_vm2 = vcmask (!%p201_p2), 1041409   ;;  %vm1695_vm3 = vcmask (!%p201_p2), 1042434  }
   0xd   : > { %s2884_s22 = smov (!%p235_p3, %s1970_s22), 63  ;;  %2111 = vmatpush3.bf16.msra.mxu1 %v2297_v17  ;;  %v2302_v31 = vld [vmem:[%s2880_s3 + $0x40] ss:$16 sps:$4 sm:$0xff]   ;;  %v706_v44 = vsub.s32 0, %v2576_v43  ;;  %vm1698_vm4 = vcmask 1043459   ;;  %vm1701_vm5 = vcmask 1044484  }
   0xe   : > { %s1971_s6 = sshll.u32 %s2884_s22, 2  ;;  %2112 = vmatprep.subr.bf16.mxu1 %v2300_v18  ;;  %v2304_v32 = vld [vmem:[%s2880_s3 + $0x60] ss:$16 sps:$4 sm:$0xff]   ;;  %s2886_s7 = smov (!%p241_p4, %s1972_s7), 3  ;;  %vm1704_vm6 = vcmask 1045509   ;;  %vm1707_vm7 = vcmask 1046534  }
   0xf   : > { %s2486_s13 = scalar_lea.vmem %s2877_s0, %s1971_s6  ;;  %516 = vmatpush1.bf16.msra.mxu0 %v2265_v6  ;;  %v2306_v34 = vld [vmem:[%s2880_s3 + $0x80] ss:$16 sps:$4 sm:$0xff]   ;;  %s2043_s19 = sshll.u32 %s2886_s7, 4  ;;  %vm1710_vm8 = vcmask 1047559  }
  0x10   : > { %517 = vmatprep.subr.bf16.mxu0 %v2266_v7  ;;  %v2281_v19 = vld [vmem:[%s2486_s13] sm:$0xff]   ;;  %v2282_v20 = vld [vmem:[%s2486_s13 + $0x8] sm:$0xff]   ;;  %v2283_v21 = vld [vmem:[%s2486_s13 + $0x10] sm:$0xff]   ;;  %s2730_s15 = scalar_lea.vmem %s2878_s1, %s2043_s19  ;;  %s1976_s12 = sshll.u32 %s2886_s7, 3 }
  0x11   : > { %2113 = vmatpush3.bf16.msra.mxu1 %v2300_v18  ;;  %v2284_v22 = vld [vmem:[%s2486_s13 + $0x18] sm:$0xff]   ;;  %v2285_v23 = vld [vmem:[%s2486_s13 + $0x20] sm:$0xff]   ;;  %v2286_v24 = vld [vmem:[%s2486_s13 + $0x28] sm:$0xff]   ;;  %s251_s17 = scalar_lea.vmem %s2882_s5, %s1976_s12 }
  0x12   : > { %v2287_v25 = vld [vmem:[%s2486_s13 + $0x30] sm:$0xff]   ;;  %v2288_v26 = vld [vmem:[%s2486_s13 + $0x38] sm:$0xff]   ;;  %v2289_v27 = vld [vmem:[%s2486_s13 + $0x40] sm:$0xff]   ;;  %2114 = vmatprep.subr.bf16.mxu1 %v2302_v31 }
  0x13   : > { %518 = vmatpush1.bf16.msra.mxu0 %v2268_v8  ;;  %v2290_v28 = vld [vmem:[%s2486_s13 + $0x48] sm:$0xff]   ;;  %v2291_v29 = vld [vmem:[%s2486_s13 + $0x50] sm:$0xff]   ;;  %v2292_v30 = vld [vmem:[%s2486_s13 + $0x58] sm:$0xff]  }
  0x14   : > { %519 = vmatprep.subr.bf16.mxu0 %v2269_v9  ;;  %v2293_v33 = vld [vmem:[%s2486_s13 + $0x60] sm:$0xff]   ;;  %v2294_v36 = vld [vmem:[%s2486_s13 + $0x68] sm:$0xff]   ;;  %v2295_v40 = vld [vmem:[%s2486_s13 + $0x70] sm:$0xff]  }
  0x15   : > { %2115 = vmatpush3.bf16.msra.mxu1 %v2302_v31  ;;  %v2308_v35 = vld [vmem:[%s2880_s3 + $0xa0] ss:$16 sps:$4 sm:$0xff]   ;;  %v2296_v41 = vld [vmem:[%s2486_s13 + $0x78] sm:$0xff]  }
  0x16   : > { %2116 = vmatprep.subr.bf16.mxu1 %v2304_v32  ;;  %v2310_v37 = vld [vmem:[%s2880_s3 + $0xc0] ss:$16 sps:$4 sm:$0xff]  }
  0x17   : > { %520 = vmatpush1.bf16.msra.mxu0 %v2271_v10  ;;  %v2312_v39 = vld [vmem:[%s2880_s3 + $0xe0] ss:$16 sps:$4 sm:$0xff]  }
  0x18   : > { %521 = vmatprep.subr.bf16.mxu0 %v2272_v11  ;;  %v2582_v45 = vld [vmem:[%s2881_s4] sm:$0xff] }
  0x19   : > { %2117 = vmatpush3.bf16.msra.mxu1 %v2304_v32  ;;  %v2585_v46 = vrot.slane %v2582_v45, %v706_v44  ;;  %v2315_v32 = vld [vmem:[%s2880_s3 + $0x44] ss:$16 sps:$4 sm:$0xff]  }
  0x1a   : > { %2118 = vmatprep.subr.bf16.mxu1 %v2306_v34 }
  0x1b   : > { %522 = vmatpush1.bf16.msra.mxu0 %v2274_v12 }
  0x1c   : > { %523 = vmatprep.subr.bf16.mxu0 %v2275_v13 }
  0x1d   : > { %2119 = vmatpush3.bf16.msra.mxu1 %v2306_v34 }
  0x1e   : > { %2120 = vmatprep.subr.bf16.mxu1 %v2308_v35 }
  0x1f   : > { %524 = vmatpush1.bf16.msra.mxu0 %v2277_v14 }
  0x20   : > { %525 = vmatprep.subr.bf16.mxu0 %v2278_v15 }
  0x21   : > { %2121 = vmatpush3.bf16.msra.mxu1 %v2308_v35 }
  0x22   : > { %2122 = vmatprep.subr.bf16.mxu1 %v2310_v37 }
  0x23   : > { %526 = vmatpush1.bf16.msra.mxu0 %v2280_v16 }
  0x25   : > { %2123 = vmatpush3.bf16.msra.mxu1 %v2310_v37 }
  0x26   : > { %544 = vmatmul.mubr.bf16.vlgmr.msra.gmra.mrb[0].mxu0 %v2281_v19  ;;  %2124 = vmatprep.subr.bf16.mxu1 %v2312_v39 }
  0x27   : > { %553 = vmatprep.mubr.bf16.mxu0 %v2418_v2 }
  0x29   : > { %2125 = vmatpush3.bf16.msra.mxu1 %v2312_v39 }
  0x2a   : > { %2158 = vmatprep.subr.bf16.mxu1 %v2566_v38 }
  0x2e   : > { %554 = vmatmul.mubr.bf16.gmra.mrb[4].mxu0 %v2282_v20 }
  0x2f   : > { %563 = vmatprep.mubr.bf16.mxu0 %v2418_v2 }
  0x36   : > { %564 = vmatmul.mubr.bf16.gmra.mrb[8].mxu0 %v2283_v21 }
  0x37   : > { %573 = vmatprep.mubr.bf16.mxu0 %v2418_v2 }
  0x3e   : > { %574 = vmatmul.mubr.bf16.gmra.mrb[12].mxu0 %v2284_v22 }
  0x3f   : > { %583 = vmatprep.mubr.bf16.mxu0 %v2418_v2 }
  0x46   : > { %584 = vmatmul.mubr.bf16.gmra.mrb[16].mxu0 %v2285_v23  ;;  %v2314_v23 = vld [vmem:[%s2880_s3 + $0x24] ss:$16 sps:$4 sm:$0xff]  }
  0x47   : > { %593 = vmatprep.mubr.bf16.mxu0 %v2418_v2 }
  0x4e   : > { %594 = vmatmul.mubr.bf16.gmra.mrb[20].mxu0 %v2286_v24 }
  0x4f   : > { %603 = vmatprep.mubr.bf16.mxu0 %v2418_v2 }
  0x56   : > { %604 = vmatmul.mubr.bf16.gmra.mrb[24].mxu0 %v2287_v25 }
  0x57   : > { %613 = vmatprep.mubr.bf16.mxu0 %v2418_v2 }
  0x5e   : > { %614 = vmatmul.mubr.bf16.gmra.mrb[28].mxu0 %v2288_v26 }
  0x5f   : > { %623 = vmatprep.mubr.bf16.mxu0 %v2418_v2 }
  0x66   : > { %624 = vmatmul.mubr.bf16.gmra.mrb[32].mxu0 %v2289_v27 }
  0x67   : > { %633 = vmatprep.mubr.bf16.mxu0 %v2418_v2 }
  0x6e   : > { %634 = vmatmul.mubr.bf16.gmra.mrb[36].mxu0 %v2290_v28 }
  0x6f   : > { %643 = vmatprep.mubr.bf16.mxu0 %v2418_v2 }
  0x76   : > { %644 = vmatmul.mubr.bf16.gmra.mrb[40].mxu0 %v2291_v29 }
  0x77   : > { %653 = vmatprep.mubr.bf16.mxu0 %v2418_v2 }
  0x7e   : > { %654 = vmatmul.mubr.bf16.gmra.mrb[44].mxu0 %v2292_v30 }
  0x7f   : > { %663 = vmatprep.mubr.bf16.mxu0 %v2418_v2 }
  0x86   : > { %664 = vmatmul.mubr.bf16.gmra.mrb[48].mxu0 %v2293_v33 }
  0x87   : > { %673 = vmatprep.mubr.bf16.mxu0 %v2418_v2 }
  0x8e   : > { %674 = vmatmul.mubr.bf16.gmra.mrb[52].mxu0 %v2294_v36 }
  0x8f   : > { %683 = vmatprep.mubr.bf16.mxu0 %v2418_v2 }
  0x96   : > { %684 = vmatmul.mubr.bf16.gmra.mrb[56].mxu0 %v2295_v40 }
  0x97   : > { %693 = vmatprep.mubr.bf16.mxu0 %v2418_v2 }
  0x9e   : > { %694 = vmatmul.mubr.bf16.gmra.mrb[60].mxu0 %v2296_v41 }
  0xf9   : > { %v545_v47 = vpop.f32.mrb[0].mxu0 }
  0xfa   : > { %v547_v48 = vpop.f32.mrb[1].mxu0  ;;  %v708_v50 = vadd.f32 %v2585_v46, %v545_v47 }
  0xfb   : > { %2345 = vtanh.f32 %v547_v48  ;;  %v549_v49 = vpop.f32.mrb[2].mxu0 }
  0xfc   : > { %v551_v51 = vpop.f32.mrb[3].mxu0  ;;  %v709_v52 = vadd.f32 %v2585_v46, %v549_v49  ;;  %v740_v53 = vmul.f32 0.01, %v708_v50 }
  0xfd   : > { %2347 = vtanh.f32 %v551_v51 }
  0xfe   : > { %v741_v55 = vmul.f32 0.01, %v709_v52  ;;  %v772_v58 = vmax.f32 %v708_v50, %v740_v53 }
 0x100   : > { %v773_v62 = vmax.f32 %v709_v52, %v741_v55  ;;  %v2317_v52 = vld [vmem:[%s2880_s3 + $0x84] ss:$16 sps:$4 sm:$0xff]  }
 0x101   : > { %v555_v54 = vpop.f32.mrb[4].mxu0 }
 0x102   : > { %v557_v56 = vpop.f32.mrb[5].mxu0  ;;  %v710_v59 = vadd.f32 %v2585_v46, %v555_v54 }
 0x103   : > { %2349 = vtanh.f32 %v557_v56  ;;  %v559_v57 = vpop.f32.mrb[6].mxu0 }
 0x104   : > { %v561_v60 = vpop.f32.mrb[7].mxu0  ;;  %v711_v63 = vadd.f32 %v2585_v46, %v559_v57  ;;  %v742_v2 = vmul.f32 0.01, %v710_v59 }
 0x105   : > { %v2346_v61 = vpop.eup %2345  ;;  %2351 = vtanh.f32 %v561_v60 }
 0x106   : > { %v836_v0 = vmul.f32 %v2346_v61, %v772_v58  ;;  %v743_v5 = vmul.f32 0.01, %v711_v63  ;;  %v774_v9 = vmax.f32 %v710_v59, %v742_v2 }
 0x107   : > { %v2348_v1 = vpop.eup %2347 }
 0x108   : > { %v837_v3 = vmul.f32 %v2348_v1, %v773_v62  ;;  %v775_v13 = vmax.f32 %v711_v63, %v743_v5 }
 0x109   : > { %v565_v4 = vpop.f32.mrb[8].mxu0 }
 0x10a   : > { %v567_v6 = vpop.f32.mrb[9].mxu0  ;;  %v868_v7 = vpack.c.bf16 %v837_v3, %v836_v0  ;;  %v712_v10 = vadd.f32 %v2585_v46, %v565_v4 }
 0x10b   : > { %2353 = vtanh.f32 %v567_v6  ;;  %v569_v8 = vpop.f32.mrb[10].mxu0 }
 0x10c   : > { %v571_v11 = vpop.f32.mrb[11].mxu0  ;;  %2126 = vmatprep.mubr.bf16.mxu1 %v868_v7  ;;  %v713_v14 = vadd.f32 %v2585_v46, %v569_v8  ;;  %v744_v17 = vmul.f32 0.01, %v712_v10 }
 0x10d   : > { %v2350_v12 = vpop.eup %2349  ;;  %2355 = vtanh.f32 %v571_v11 }
 0x10e   : > { %v838_v15 = vmul.f32 %v2350_v12, %v774_v9  ;;  %v745_v20 = vmul.f32 0.01, %v713_v14  ;;  %v776_v25 = vmax.f32 %v712_v10, %v744_v17 }
 0x10f   : > { %v2352_v16 = vpop.eup %2351 }
 0x110   : > { %v839_v18 = vmul.f32 %v2352_v16, %v775_v13  ;;  %v777_v29 = vmax.f32 %v713_v14, %v745_v20 }
 0x111   : > { %v575_v19 = vpop.f32.mrb[12].mxu0 }
 0x112   : > { %v577_v21 = vpop.f32.mrb[13].mxu0  ;;  %v869_v22 = vpack.c.bf16 %v839_v18, %v838_v15  ;;  %v714_v26 = vadd.f32 %v2585_v46, %v575_v19 }
 0x113   : > { %2357 = vtanh.f32 %v577_v21  ;;  %v579_v24 = vpop.f32.mrb[14].mxu0 }
 0x114   : > { %v581_v27 = vpop.f32.mrb[15].mxu0  ;;  %2127 = vmatmul.mubr.bf16.vlgmr.msra.gmra.mrb[0].mxu1 %v869_v22  ;;  %v715_v30 = vadd.f32 %v2585_v46, %v579_v24  ;;  %v746_v34 = vmul.f32 0.01, %v714_v26 }
 0x115   : > { %v2354_v28 = vpop.eup %2353  ;;  %2359 = vtanh.f32 %v581_v27  ;;  %2159 = vmatpush3.bf16.msra.mxu1 %v2566_v38  ;;  %v2316_v38 = vld [vmem:[%s2880_s3 + $0x64] ss:$16 sps:$4 sm:$0xff]  }
 0x116   : > { %v840_v31 = vmul.f32 %v2354_v28, %v776_v25  ;;  %2160 = vmatprep.subr.bf16.mxu1 %v2314_v23  ;;  %v747_v37 = vmul.f32 0.01, %v715_v30  ;;  %v778_v42 = vmax.f32 %v714_v26, %v746_v34 }
 0x117   : > { %v2356_v33 = vpop.eup %2355 }
 0x118   : > { %v841_v35 = vmul.f32 %v2356_v33, %v777_v29  ;;  %v779_v49 = vmax.f32 %v715_v30, %v747_v37 }
 0x119   : > { %v585_v36 = vpop.f32.mrb[16].mxu0  ;;  %2161 = vmatpush3.bf16.msra.mxu1 %v2314_v23 }
 0x11a   : > { %v587_v39 = vpop.f32.mrb[17].mxu0  ;;  %v870_v40 = vpack.c.bf16 %v841_v35, %v840_v31  ;;  %2162 = vmatprep.subr.bf16.mxu1 %v2315_v32  ;;  %v716_v44 = vadd.f32 %v2585_v46, %v585_v36 }
 0x11b   : > { %2361 = vtanh.f32 %v587_v39  ;;  %v589_v41 = vpop.f32.mrb[18].mxu0 }
 0x11c   : > { %v591_v47 = vpop.f32.mrb[19].mxu0  ;;  %2130 = vmatprep.mubr.bf16.mxu1 %v870_v40  ;;  %v717_v50 = vadd.f32 %v2585_v46, %v589_v41  ;;  %v748_v54 = vmul.f32 0.01, %v716_v44 }
 0x11d   : > { %v2358_v48 = vpop.eup %2357  ;;  %2363 = vtanh.f32 %v591_v47  ;;  %2163 = vmatpush3.bf16.msra.mxu1 %v2315_v32 }
 0x11e   : > { %v842_v51 = vmul.f32 %v2358_v48, %v778_v42  ;;  %2164 = vmatprep.subr.bf16.mxu1 %v2316_v38  ;;  %v749_v57 = vmul.f32 0.01, %v717_v50  ;;  %v780_v61 = vmax.f32 %v716_v44, %v748_v54 }
 0x11f   : > { %v2360_v53 = vpop.eup %2359 }
 0x120   : > { %v843_v55 = vmul.f32 %v2360_v53, %v779_v49  ;;  %v781_v1 = vmax.f32 %v717_v50, %v749_v57 }
 0x121   : > { %v595_v56 = vpop.f32.mrb[20].mxu0  ;;  %2165 = vmatpush3.bf16.msra.mxu1 %v2316_v38 }
 0x122   : > { %v597_v58 = vpop.f32.mrb[21].mxu0  ;;  %v871_v59 = vpack.c.bf16 %v843_v55, %v842_v51  ;;  %2166 = vmatprep.subr.bf16.mxu1 %v2317_v52  ;;  %v718_v62 = vadd.f32 %v2585_v46, %v595_v56 }
 0x123   : > { %2365 = vtanh.f32 %v597_v58  ;;  %v599_v60 = vpop.f32.mrb[22].mxu0 }
 0x124   : > { %v601_v63 = vpop.f32.mrb[23].mxu0  ;;  %2131 = vmatmul.mubr.bf16.gmra.mrb[4].mxu1 %v871_v59  ;;  %v719_v2 = vadd.f32 %v2585_v46, %v599_v60  ;;  %v750_v5 = vmul.f32 0.01, %v718_v62 }
 0x125   : > { %v2362_v0 = vpop.eup %2361  ;;  %2367 = vtanh.f32 %v601_v63  ;;  %2167 = vmatpush3.bf16.msra.mxu1 %v2317_v52 }
 0x126   : > { %v844_v3 = vmul.f32 %v2362_v0, %v780_v61  ;;  %v751_v8 = vmul.f32 0.01, %v719_v2  ;;  %v782_v12 = vmax.f32 %v718_v62, %v750_v5 }
 0x127   : > { %v2364_v4 = vpop.eup %2363 }
 0x128   : > { %v845_v6 = vmul.f32 %v2364_v4, %v781_v1  ;;  %v783_v16 = vmax.f32 %v719_v2, %v751_v8 }
 0x129   : > { %v605_v7 = vpop.f32.mrb[24].mxu0 }
 0x12a   : > { %v607_v9 = vpop.f32.mrb[25].mxu0  ;;  %v872_v10 = vpack.c.bf16 %v845_v6, %v844_v3  ;;  %v720_v13 = vadd.f32 %v2585_v46, %v605_v7 }
 0x12b   : > { %2369 = vtanh.f32 %v607_v9  ;;  %v609_v11 = vpop.f32.mrb[26].mxu0 }
 0x12c   : > { %v611_v14 = vpop.f32.mrb[27].mxu0  ;;  %2134 = vmatprep.mubr.bf16.mxu1 %v872_v10  ;;  %v721_v17 = vadd.f32 %v2585_v46, %v609_v11  ;;  %v752_v20 = vmul.f32 0.01, %v720_v13 }
 0x12d   : > { %v2366_v15 = vpop.eup %2365  ;;  %2371 = vtanh.f32 %v611_v14 }
 0x12e   : > { %v846_v18 = vmul.f32 %v2366_v15, %v782_v12  ;;  %v753_v23 = vmul.f32 0.01, %v721_v17  ;;  %v784_v27 = vmax.f32 %v720_v13, %v752_v20 }
 0x12f   : > { %v2368_v19 = vpop.eup %2367 }
 0x130   : > { %v847_v21 = vmul.f32 %v2368_v19, %v783_v16  ;;  %v785_v31 = vmax.f32 %v721_v17, %v753_v23 }
 0x131   : > { %v615_v22 = vpop.f32.mrb[28].mxu0 }
 0x132   : > { %v617_v24 = vpop.f32.mrb[29].mxu0  ;;  %v873_v25 = vpack.c.bf16 %v847_v21, %v846_v18  ;;  %v722_v28 = vadd.f32 %v2585_v46, %v615_v22 }
 0x133   : > { %2373 = vtanh.f32 %v617_v24  ;;  %v619_v26 = vpop.f32.mrb[30].mxu0 }
 0x134   : > { %v621_v29 = vpop.f32.mrb[31].mxu0  ;;  %2135 = vmatmul.mubr.bf16.gmra.mrb[8].mxu1 %v873_v25  ;;  %v723_v32 = vadd.f32 %v2585_v46, %v619_v26  ;;  %v754_v35 = vmul.f32 0.01, %v722_v28 }
 0x135   : > { %v2370_v30 = vpop.eup %2369  ;;  %2375 = vtanh.f32 %v621_v29 }
 0x136   : > { %v848_v33 = vmul.f32 %v2370_v30, %v784_v27  ;;  %v755_v39 = vmul.f32 0.01, %v723_v32  ;;  %v786_v42 = vmax.f32 %v722_v28, %v754_v35 }
 0x137   : > { %v2372_v34 = vpop.eup %2371 }
 0x138   : > { %v849_v36 = vmul.f32 %v2372_v34, %v785_v31  ;;  %v787_v49 = vmax.f32 %v723_v32, %v755_v39 }
 0x139   : > { %v625_v37 = vpop.f32.mrb[32].mxu0 }
 0x13a   : > { %v627_v40 = vpop.f32.mrb[33].mxu0  ;;  %v874_v38 = vpack.c.bf16 %v849_v36, %v848_v33  ;;  %v724_v44 = vadd.f32 %v2585_v46, %v625_v37 }
 0x13b   : > { %2377 = vtanh.f32 %v627_v40  ;;  %v629_v41 = vpop.f32.mrb[34].mxu0 }
 0x13c   : > { %v631_v47 = vpop.f32.mrb[35].mxu0  ;;  %2138 = vmatprep.mubr.bf16.mxu1 %v874_v38  ;;  %v725_v50 = vadd.f32 %v2585_v46, %v629_v41  ;;  %v756_v53 = vmul.f32 0.01, %v724_v44 }
 0x13d   : > { %v2374_v48 = vpop.eup %2373  ;;  %2379 = vtanh.f32 %v631_v47 }
 0x13e   : > { %v850_v51 = vmul.f32 %v2374_v48, %v786_v42  ;;  %v757_v56 = vmul.f32 0.01, %v725_v50  ;;  %v788_v60 = vmax.f32 %v724_v44, %v756_v53 }
 0x13f   : > { %v2376_v52 = vpop.eup %2375 }
 0x140   : > { %v851_v54 = vmul.f32 %v2376_v52, %v787_v49  ;;  %v789_v0 = vmax.f32 %v725_v50, %v757_v56 }
 0x141   : > { %v635_v55 = vpop.f32.mrb[36].mxu0 }
 0x142   : > { %v637_v57 = vpop.f32.mrb[37].mxu0  ;;  %v875_v58 = vpack.c.bf16 %v851_v54, %v850_v51  ;;  %v726_v61 = vadd.f32 %v2585_v46, %v635_v55 }
 0x143   : > { %2381 = vtanh.f32 %v637_v57  ;;  %v639_v59 = vpop.f32.mrb[38].mxu0 }
 0x144   : > { %v641_v62 = vpop.f32.mrb[39].mxu0  ;;  %2139 = vmatmul.mubr.bf16.gmra.mrb[12].mxu1 %v875_v58  ;;  %v727_v1 = vadd.f32 %v2585_v46, %v639_v59  ;;  %v758_v4 = vmul.f32 0.01, %v726_v61 }
 0x145   : > { %v2378_v63 = vpop.eup %2377  ;;  %2383 = vtanh.f32 %v641_v62 }
 0x146   : > { %v852_v2 = vmul.f32 %v2378_v63, %v788_v60  ;;  %v759_v7 = vmul.f32 0.01, %v727_v1  ;;  %v790_v11 = vmax.f32 %v726_v61, %v758_v4 }
 0x147   : > { %v2380_v3 = vpop.eup %2379 }
 0x148   : > { %v853_v5 = vmul.f32 %v2380_v3, %v789_v0  ;;  %v791_v15 = vmax.f32 %v727_v1, %v759_v7 }
 0x149   : > { %v645_v6 = vpop.f32.mrb[40].mxu0 }
 0x14a   : > { %v647_v8 = vpop.f32.mrb[41].mxu0  ;;  %v876_v9 = vpack.c.bf16 %v853_v5, %v852_v2  ;;  %v728_v12 = vadd.f32 %v2585_v46, %v645_v6  ;;  %v2318_v2 = vld [vmem:[%s2880_s3 + $0xa4] ss:$16 sps:$4 sm:$0xff]  }
 0x14b   : > { %2385 = vtanh.f32 %v647_v8  ;;  %v649_v10 = vpop.f32.mrb[42].mxu0  ;;  %2168 = vmatprep.subr.bf16.mxu1 %v2318_v2 }
 0x14c   : > { %v651_v13 = vpop.f32.mrb[43].mxu0  ;;  %2142 = vmatprep.mubr.bf16.mxu1 %v876_v9  ;;  %v729_v16 = vadd.f32 %v2585_v46, %v649_v10  ;;  %v760_v19 = vmul.f32 0.01, %v728_v12  ;;  %2169 = vmatpush3.bf16.msra.mxu1 %v2318_v2  ;;  %v2319_v10 = vld [vmem:[%s2880_s3 + $0xc4] ss:$16 sps:$4 sm:$0xff]  }
 0x14d   : > { %v2382_v14 = vpop.eup %2381  ;;  %2387 = vtanh.f32 %v651_v13  ;;  %2170 = vmatprep.subr.bf16.mxu1 %v2319_v10 }
 0x14e   : > { %v854_v17 = vmul.f32 %v2382_v14, %v790_v11  ;;  %v761_v22 = vmul.f32 0.01, %v729_v16  ;;  %v792_v26 = vmax.f32 %v728_v12, %v760_v19  ;;  %v2320_v19 = vld [vmem:[%s2880_s3 + $0xe4] ss:$16 sps:$4 sm:$0xff]  }
 0x14f   : > { %v2384_v18 = vpop.eup %2383 }
 0x150   : > { %v855_v20 = vmul.f32 %v2384_v18, %v791_v15  ;;  %v793_v30 = vmax.f32 %v729_v16, %v761_v22  ;;  %2171 = vmatpush3.bf16.msra.mxu1 %v2319_v10 }
 0x151   : > { %v655_v21 = vpop.f32.mrb[44].mxu0  ;;  %2172 = vmatprep.subr.bf16.mxu1 %v2320_v19 }
 0x152   : > { %v657_v23 = vpop.f32.mrb[45].mxu0  ;;  %v877_v24 = vpack.c.bf16 %v855_v20, %v854_v17  ;;  %v730_v27 = vadd.f32 %v2585_v46, %v655_v21 }
 0x153   : > { %2389 = vtanh.f32 %v657_v23  ;;  %v659_v25 = vpop.f32.mrb[46].mxu0 }
 0x154   : > { %v661_v28 = vpop.f32.mrb[47].mxu0  ;;  %2143 = vmatmul.mubr.bf16.gmra.mrb[16].mxu1 %v877_v24  ;;  %v731_v31 = vadd.f32 %v2585_v46, %v659_v25  ;;  %v762_v34 = vmul.f32 0.01, %v730_v27 }
 0x155   : > { %v2386_v29 = vpop.eup %2385  ;;  %2391 = vtanh.f32 %v661_v28  ;;  %2173 = vmatpush3.bf16.msra.mxu1 %v2320_v19 }
 0x156   : > { %v856_v32 = vmul.f32 %v2386_v29, %v792_v26  ;;  %v763_v37 = vmul.f32 0.01, %v731_v31  ;;  %v794_v41 = vmax.f32 %v730_v27, %v762_v34 }
 0x157   : > { %v2388_v33 = vpop.eup %2387 }
 0x158   : > { %v857_v35 = vmul.f32 %v2388_v33, %v793_v30  ;;  %v795_v48 = vmax.f32 %v731_v31, %v763_v37 }
 0x159   : > { %v665_v36 = vpop.f32.mrb[48].mxu0 }
 0x15a   : > { %v667_v39 = vpop.f32.mrb[49].mxu0  ;;  %v878_v40 = vpack.c.bf16 %v857_v35, %v856_v32  ;;  %v732_v42 = vadd.f32 %v2585_v46, %v665_v36 }
 0x15b   : > { %2393 = vtanh.f32 %v667_v39  ;;  %v669_v38 = vpop.f32.mrb[50].mxu0 }
 0x15c   : > { %v671_v44 = vpop.f32.mrb[51].mxu0  ;;  %2146 = vmatprep.mubr.bf16.mxu1 %v878_v40  ;;  %v733_v49 = vadd.f32 %v2585_v46, %v669_v38  ;;  %v764_v52 = vmul.f32 0.01, %v732_v42 }
 0x15d   : > { %v2390_v47 = vpop.eup %2389  ;;  %2395 = vtanh.f32 %v671_v44 }
 0x15e   : > { %v858_v50 = vmul.f32 %v2390_v47, %v794_v41  ;;  %v765_v55 = vmul.f32 0.01, %v733_v49  ;;  %v796_v59 = vmax.f32 %v732_v42, %v764_v52 }
 0x15f   : > { %v2392_v51 = vpop.eup %2391 }
 0x160   : > { %v859_v53 = vmul.f32 %v2392_v51, %v795_v48  ;;  %v797_v63 = vmax.f32 %v733_v49, %v765_v55 }
 0x161   : > { %v675_v54 = vpop.f32.mrb[52].mxu0 }
 0x162   : > { %v677_v56 = vpop.f32.mrb[53].mxu0  ;;  %v879_v57 = vpack.c.bf16 %v859_v53, %v858_v50  ;;  %v734_v60 = vadd.f32 %v2585_v46, %v675_v54  ;;  %v886_v50 = vsub.s32 1, %v2576_v43 }
 0x163   : > { %2397 = vtanh.f32 %v677_v56  ;;  %v679_v58 = vpop.f32.mrb[54].mxu0 }
 0x164   : > { %v681_v61 = vpop.f32.mrb[55].mxu0  ;;  %2147 = vmatmul.mubr.bf16.gmra.mrb[20].mxu1 %v879_v57  ;;  %v735_v0 = vadd.f32 %v2585_v46, %v679_v58  ;;  %v766_v4 = vmul.f32 0.01, %v734_v60  ;;  %v2643_v51 = vrot.slane %v2582_v45, %v886_v50 }
 0x165   : > { %v2394_v62 = vpop.eup %2393  ;;  %2399 = vtanh.f32 %v681_v61 }
 0x166   : > { %v860_v1 = vmul.f32 %v2394_v62, %v796_v59  ;;  %v767_v7 = vmul.f32 0.01, %v735_v0  ;;  %v798_v12 = vmax.f32 %v734_v60, %v766_v4 }
 0x167   : > { %v2396_v3 = vpop.eup %2395 }
 0x168   : > { %v861_v5 = vmul.f32 %v2396_v3, %v797_v63  ;;  %v799_v16 = vmax.f32 %v735_v0, %v767_v7 }
 0x169   : > { %v685_v6 = vpop.f32.mrb[56].mxu0 }
 0x16a   : > { %v687_v8 = vpop.f32.mrb[57].mxu0  ;;  %v880_v9 = vpack.c.bf16 %v861_v5, %v860_v1  ;;  %v736_v13 = vadd.f32 %v2585_v46, %v685_v6 }
 0x16b   : > { %2401 = vtanh.f32 %v687_v8  ;;  %v689_v11 = vpop.f32.mrb[58].mxu0 }
 0x16c   : > { %v691_v14 = vpop.f32.mrb[59].mxu0  ;;  %2150 = vmatprep.mubr.bf16.mxu1 %v880_v9  ;;  %v737_v17 = vadd.f32 %v2585_v46, %v689_v11  ;;  %v768_v21 = vmul.f32 0.01, %v736_v13 }
 0x16d   : > { %v2398_v15 = vpop.eup %2397  ;;  %2403 = vtanh.f32 %v691_v14 }
 0x16e   : > { %v862_v18 = vmul.f32 %v2398_v15, %v798_v12  ;;  %v769_v24 = vmul.f32 0.01, %v737_v17  ;;  %v800_v28 = vmax.f32 %v736_v13, %v768_v21 }
 0x16f   : > { %v2400_v20 = vpop.eup %2399 }
 0x170   : > { %v863_v22 = vmul.f32 %v2400_v20, %v799_v16  ;;  %v801_v32 = vmax.f32 %v737_v17, %v769_v24 }
 0x171   : > { %v695_v23 = vpop.f32.mrb[60].mxu0 }
 0x172   : > { %v697_v25 = vpop.f32.mrb[61].mxu0  ;;  %v881_v26 = vpack.c.bf16 %v863_v22, %v862_v18  ;;  %v738_v29 = vadd.f32 %v2585_v46, %v695_v23 }
 0x173   : > { %2405 = vtanh.f32 %v697_v25  ;;  %v699_v27 = vpop.f32.mrb[62].mxu0 }
 0x174   : > { %v701_v30 = vpop.f32.mrb[63].mxu0  ;;  %2151 = vmatmul.mubr.bf16.gmra.mrb[24].mxu1 %v881_v26  ;;  %v739_v33 = vadd.f32 %v2585_v46, %v699_v27  ;;  %v770_v36 = vmul.f32 0.01, %v738_v29 }
 0x175   : > { %v2402_v31 = vpop.eup %2401  ;;  %2407 = vtanh.f32 %v701_v30 }
 0x176   : > { %v864_v34 = vmul.f32 %v2402_v31, %v800_v28  ;;  %v771_v39 = vmul.f32 0.01, %v739_v33  ;;  %v802_v38 = vmax.f32 %v738_v29, %v770_v36 }
 0x177   : > { %v2404_v35 = vpop.eup %2403 }
 0x178   : > { %v865_v37 = vmul.f32 %v2404_v35, %v801_v32  ;;  %v803_v42 = vmax.f32 %v739_v33, %v771_v39 }
 0x17a   : > { %v882_v40 = vpack.c.bf16 %v865_v37, %v864_v34 }
 0x17c   : > { %2154 = vmatprep.mubr.bf16.mxu1 %v882_v40 }
 0x17d   : > { %v2406_v41 = vpop.eup %2405 }
 0x17e   : > { %v866_v44 = vmul.f32 %v2406_v41, %v802_v38 }
 0x17f   : > { %v2408_v47 = vpop.eup %2407 }
 0x180   : > { %v867_v48 = vmul.f32 %v2408_v47, %v803_v42 }
 0x182   : > { %v883_v49 = vpack.c.bf16 %v867_v48, %v866_v44 }
 0x184   : > { %2155 = vmatmul.mubr.bf16.gmra.mrb[28].mxu1 %v883_v49 }
 0x1e7   : > { %v2128_v46 = vpop.f32.mrb[0].mxu1 }
 0x1e8   : > { %v979_v52 = vadd.f32 %v2128_v46, %v2643_v51  ;;  %v970_v53 = vpop.f32.mrb[1].mxu1 }
 0x1e9   : > { %v971_v54 = vadd.f32 %v970_v53, %v2643_v51  ;;  %v2129_v55 = vpop.f32.mrb[2].mxu1 }
 0x1ea   : > { %v1099_v56 = vmul.f32 0.01, %v979_v52  ;;  %v982_v57 = vadd.f32 %v2129_v55, %v2643_v51  ;;  %v973_v58 = vpop.f32.mrb[3].mxu1 }
 0x1eb   : > { %v1097_v59 = vmul.f32 0.01, %v971_v54  ;;  %v974_v60 = vadd.f32 %v973_v58, %v2643_v51 }
 0x1ec   : > { %v1100_v61 = vmul.f32 0.01, %v982_v57  ;;  %v1131_v63 = vmax.f32 %v979_v52, %v1099_v56 }
 0x1ed   : > { %v1098_v62 = vmul.f32 0.01, %v974_v60  ;;  %v1129_v1 = vmax.f32 %v971_v54, %v1097_v59 }
 0x1ee   : > { %v1132_v0 = vmax.f32 %v982_v57, %v1100_v61 }
 0x1ef   : > { %v1130_v2 = vmax.f32 %v974_v60, %v1098_v62 }
 0x1f0   : > { %v1162_v3 = vpack.c.bf16 %v1132_v0, %v1131_v63 }
 0x1f1   : > { %v1161_v4 = vpack.c.bf16 %v1130_v2, %v1129_v1 }
 0x1f3   : > { %2174 = vmatprep.mubr.bf16.mxu1 %v1161_v4 }
 0x1f4   : > { %2175 = vmatmul.mubr.bf16.vlgmr.msra.gmra.mrb[32].mxu1 %v1162_v3 }
 0x1f7   : > { %v2132_v5 = vpop.f32.mrb[4].mxu1 }
 0x1f8   : > { %v995_v6 = vadd.f32 %v2132_v5, %v2643_v51  ;;  %v986_v7 = vpop.f32.mrb[5].mxu1 }
 0x1f9   : > { %v987_v8 = vadd.f32 %v986_v7, %v2643_v51  ;;  %v2133_v9 = vpop.f32.mrb[6].mxu1 }
 0x1fa   : > { %v1103_v10 = vmul.f32 0.01, %v995_v6  ;;  %v998_v11 = vadd.f32 %v2133_v9, %v2643_v51  ;;  %v989_v12 = vpop.f32.mrb[7].mxu1 }
 0x1fb   : > { %v1101_v13 = vmul.f32 0.01, %v987_v8  ;;  %v990_v14 = vadd.f32 %v989_v12, %v2643_v51 }
 0x1fc   : > { %v1104_v15 = vmul.f32 0.01, %v998_v11  ;;  %v1135_v17 = vmax.f32 %v995_v6, %v1103_v10 }
 0x1fd   : > { %v1102_v16 = vmul.f32 0.01, %v990_v14  ;;  %v1133_v19 = vmax.f32 %v987_v8, %v1101_v13 }
 0x1fe   : > { %v1136_v18 = vmax.f32 %v998_v11, %v1104_v15 }
 0x1ff   : > { %v1134_v20 = vmax.f32 %v990_v14, %v1102_v16 }
 0x200   : > { %v1164_v21 = vpack.c.bf16 %v1136_v18, %v1135_v17 }
 0x201   : > { %v1163_v22 = vpack.c.bf16 %v1134_v20, %v1133_v19 }
 0x203   : > { %2178 = vmatprep.mubr.bf16.mxu1 %v1163_v22 }
 0x204   : > { %2179 = vmatmul.mubr.bf16.gmra.mrb[36].mxu1 %v1164_v21 }
 0x207   : > { %v2136_v23 = vpop.f32.mrb[8].mxu1 }
 0x208   : > { %v1011_v24 = vadd.f32 %v2136_v23, %v2643_v51  ;;  %v1002_v25 = vpop.f32.mrb[9].mxu1 }
 0x209   : > { %v1003_v26 = vadd.f32 %v1002_v25, %v2643_v51  ;;  %v2137_v27 = vpop.f32.mrb[10].mxu1 }
 0x20a   : > { %v1107_v28 = vmul.f32 0.01, %v1011_v24  ;;  %v1014_v29 = vadd.f32 %v2137_v27, %v2643_v51  ;;  %v1005_v30 = vpop.f32.mrb[11].mxu1 }
 0x20b   : > { %v1105_v31 = vmul.f32 0.01, %v1003_v26  ;;  %v1006_v32 = vadd.f32 %v1005_v30, %v2643_v51 }
 0x20c   : > { %v1108_v33 = vmul.f32 0.01, %v1014_v29  ;;  %v1139_v35 = vmax.f32 %v1011_v24, %v1107_v28 }
 0x20d   : > { %v1106_v34 = vmul.f32 0.01, %v1006_v32  ;;  %v1137_v37 = vmax.f32 %v1003_v26, %v1105_v31 }
 0x20e   : > { %v1140_v36 = vmax.f32 %v1014_v29, %v1108_v33 }
 0x20f   : > { %v1138_v39 = vmax.f32 %v1006_v32, %v1106_v34 }
 0x210   : > { %v1166_v40 = vpack.c.bf16 %v1140_v36, %v1139_v35 }
 0x211   : > { %v1165_v38 = vpack.c.bf16 %v1138_v39, %v1137_v37 }
 0x213   : > { %2182 = vmatprep.mubr.bf16.mxu1 %v1165_v38 }
 0x214   : > { %2183 = vmatmul.mubr.bf16.gmra.mrb[40].mxu1 %v1166_v40 }
 0x217   : > { %v2140_v41 = vpop.f32.mrb[12].mxu1 }
 0x218   : > { %v1027_v42 = vadd.f32 %v2140_v41, %v2643_v51  ;;  %v1018_v44 = vpop.f32.mrb[13].mxu1 }
 0x219   : > { %v1019_v47 = vadd.f32 %v1018_v44, %v2643_v51  ;;  %v2141_v48 = vpop.f32.mrb[14].mxu1 }
 0x21a   : > { %v1111_v49 = vmul.f32 0.01, %v1027_v42  ;;  %v1030_v50 = vadd.f32 %v2141_v48, %v2643_v51  ;;  %v1021_v46 = vpop.f32.mrb[15].mxu1 }
 0x21b   : > { %v1109_v52 = vmul.f32 0.01, %v1019_v47  ;;  %v1022_v53 = vadd.f32 %v1021_v46, %v2643_v51 }
 0x21c   : > { %v1112_v54 = vmul.f32 0.01, %v1030_v50  ;;  %v1143_v56 = vmax.f32 %v1027_v42, %v1111_v49 }
 0x21d   : > { %v1110_v55 = vmul.f32 0.01, %v1022_v53  ;;  %v1141_v58 = vmax.f32 %v1019_v47, %v1109_v52 }
 0x21e   : > { %v1144_v57 = vmax.f32 %v1030_v50, %v1112_v54 }
 0x21f   : > { %v1142_v59 = vmax.f32 %v1022_v53, %v1110_v55 }
 0x220   : > { %v1168_v60 = vpack.c.bf16 %v1144_v57, %v1143_v56 }
 0x221   : > { %v1167_v61 = vpack.c.bf16 %v1142_v59, %v1141_v58 }
 0x223   : > { %2186 = vmatprep.mubr.bf16.mxu1 %v1167_v61 }
 0x224   : > { %2187 = vmatmul.mubr.bf16.gmra.mrb[44].mxu1 %v1168_v60 }
 0x227   : > { %v2144_v62 = vpop.f32.mrb[16].mxu1 }
 0x228   : > { %v1043_v63 = vadd.f32 %v2144_v62, %v2643_v51  ;;  %v1034_v0 = vpop.f32.mrb[17].mxu1 }
 0x229   : > { %v1035_v1 = vadd.f32 %v1034_v0, %v2643_v51  ;;  %v2145_v2 = vpop.f32.mrb[18].mxu1 }
 0x22a   : > { %v1115_v3 = vmul.f32 0.01, %v1043_v63  ;;  %v1046_v4 = vadd.f32 %v2145_v2, %v2643_v51  ;;  %v1037_v5 = vpop.f32.mrb[19].mxu1 }
 0x22b   : > { %v1113_v6 = vmul.f32 0.01, %v1035_v1  ;;  %v1038_v7 = vadd.f32 %v1037_v5, %v2643_v51 }
 0x22c   : > { %v1116_v8 = vmul.f32 0.01, %v1046_v4  ;;  %v1147_v10 = vmax.f32 %v1043_v63, %v1115_v3 }
 0x22d   : > { %v1114_v9 = vmul.f32 0.01, %v1038_v7  ;;  %v1145_v12 = vmax.f32 %v1035_v1, %v1113_v6 }
 0x22e   : > { %v1148_v11 = vmax.f32 %v1046_v4, %v1116_v8 }
 0x22f   : > { %v1146_v13 = vmax.f32 %v1038_v7, %v1114_v9  ;;  %v2321_v9 = vld [vmem:[%s2880_s3 + $0x8] ss:$16 sps:$4 sm:$0xff]  }
 0x230   : > { %v1170_v14 = vpack.c.bf16 %v1148_v11, %v1147_v10  ;;  %v2419_v10 = vmov 0.0   ;;  %v2325_v11 = vld [vmem:[%s2880_s3 + $0x48] ss:$16 sps:$4 sm:$0xff]  }
 0x231   : > { %v1169_v15 = vpack.c.bf16 %v1146_v13, %v1145_v12  ;;  %2206 = vmatprep.subr.bf16.mxu0 %v2419_v10  ;;  %2226 = vmatprep.subr.bf16.mxu1 %v2419_v10  ;;  %v2327_v12 = vld [vmem:[%s2880_s3 + $0x68] ss:$16 sps:$4 sm:$0xff]  }
 0x232   : > { %2207 = vmatpush3.bf16.msra.mxu0 %v2321_v9  ;;  %v2329_v13 = vld [vmem:[%s2880_s3 + $0x88] ss:$16 sps:$4 sm:$0xff]   ;;  %2222 = vmatprep.mubr.msk.bf16.mxu0 %vm2420_vm1, %v2419_v10 }
 0x233   : > { %2190 = vmatprep.mubr.bf16.mxu1 %v1169_v15  ;;  %2208 = vmatprep.subr.bf16.mxu0 %v2419_v10 }
 0x234   : > { %2191 = vmatmul.mubr.bf16.gmra.mrb[48].mxu1 %v1170_v14  ;;  %v1179_v14 = vsub.s32 2, %v2576_v43 }
 0x236   : > { %v2701_v15 = vrot.slane %v2582_v45, %v1179_v14 }
 0x237   : > { %v2148_v16 = vpop.f32.mrb[20].mxu1 }
 0x238   : > { %v1059_v17 = vadd.f32 %v2148_v16, %v2643_v51  ;;  %v1050_v18 = vpop.f32.mrb[21].mxu1 }
 0x239   : > { %v1051_v19 = vadd.f32 %v1050_v18, %v2643_v51  ;;  %v2149_v20 = vpop.f32.mrb[22].mxu1 }
 0x23a   : > { %v1119_v21 = vmul.f32 0.01, %v1059_v17  ;;  %v1062_v22 = vadd.f32 %v2149_v20, %v2643_v51  ;;  %v1053_v23 = vpop.f32.mrb[23].mxu1 }
 0x23b   : > { %v1117_v24 = vmul.f32 0.01, %v1051_v19  ;;  %v1054_v25 = vadd.f32 %v1053_v23, %v2643_v51 }
 0x23c   : > { %v1120_v26 = vmul.f32 0.01, %v1062_v22  ;;  %v1151_v28 = vmax.f32 %v1059_v17, %v1119_v21 }
 0x23d   : > { %v1118_v27 = vmul.f32 0.01, %v1054_v25  ;;  %v1149_v30 = vmax.f32 %v1051_v19, %v1117_v24  ;;  %v2331_v19 = vld [vmem:[%s2880_s3 + $0xa8] ss:$16 sps:$4 sm:$0xff]  }
 0x23e   : > { %v1152_v29 = vmax.f32 %v1062_v22, %v1120_v26  ;;  %v2711_v22 = vadd.s32 8, %v2576_v43 }
 0x23f   : > { %v1150_v31 = vmax.f32 %v1054_v25, %v1118_v27 }
 0x240   : > { %v1172_v32 = vpack.c.bf16 %v1152_v29, %v1151_v28  ;;  %vm1442_vm0 = vcmp.lt.s32.totalorder %v2711_v22, 12 }
 0x241   : > { %v1171_v33 = vpack.c.bf16 %v1150_v31, %v1149_v30 }
 0x243   : > { %2194 = vmatprep.mubr.bf16.mxu1 %v1171_v33 }
 0x244   : > { %2195 = vmatmul.mubr.bf16.gmra.mrb[52].mxu1 %v1172_v32 }
 0x247   : > { %v2152_v34 = vpop.f32.mrb[24].mxu1 }
 0x248   : > { %v1075_v35 = vadd.f32 %v2152_v34, %v2643_v51  ;;  %v1066_v36 = vpop.f32.mrb[25].mxu1 }
 0x249   : > { %v1067_v37 = vadd.f32 %v1066_v36, %v2643_v51  ;;  %v2153_v39 = vpop.f32.mrb[26].mxu1 }
 0x24a   : > { %v1123_v40 = vmul.f32 0.01, %v1075_v35  ;;  %v1078_v38 = vadd.f32 %v2153_v39, %v2643_v51  ;;  %v1069_v41 = vpop.f32.mrb[27].mxu1  ;;  %v2333_v39 = vld [vmem:[%s2880_s3 + $0xc8] ss:$16 sps:$4 sm:$0xff]  }
 0x24b   : > { %v1121_v42 = vmul.f32 0.01, %v1067_v37  ;;  %v1070_v44 = vadd.f32 %v1069_v41, %v2643_v51 }
 0x24c   : > { %v1124_v47 = vmul.f32 0.01, %v1078_v38  ;;  %v1155_v49 = vmax.f32 %v1075_v35, %v1123_v40 }
 0x24d   : > { %v1122_v48 = vmul.f32 0.01, %v1070_v44  ;;  %v1153_v46 = vmax.f32 %v1067_v37, %v1121_v42  ;;  %v2335_v42 = vld [vmem:[%s2880_s3 + $0xe8] ss:$16 sps:$4 sm:$0xff]  }
 0x24e   : > { %v1156_v50 = vmax.f32 %v1078_v38, %v1124_v47  ;;  %v2737_v47 = vld [vmem:[%s2730_s15] sm:$0xff] }
 0x24f   : > { %v1154_v52 = vmax.f32 %v1070_v44, %v1122_v48 }
 0x250   : > { %v1174_v53 = vpack.c.bf16 %v1156_v50, %v1155_v49 }
 0x251   : > { %v1173_v54 = vpack.c.bf16 %v1154_v52, %v1153_v46 }
 0x253   : > { %2198 = vmatprep.mubr.bf16.mxu1 %v1173_v54 }
 0x254   : > { %2199 = vmatmul.mubr.bf16.gmra.mrb[56].mxu1 %v1174_v53 }
 0x257   : > { %v2156_v55 = vpop.f32.mrb[28].mxu1 }
 0x258   : > { %v1091_v56 = vadd.f32 %v2156_v55, %v2643_v51  ;;  %v1082_v57 = vpop.f32.mrb[29].mxu1  ;;  %v1593_v55 = vrot.slane %v2737_v47, 1 }
 0x259   : > { %v1083_v58 = vadd.f32 %v1082_v57, %v2643_v51  ;;  %v2157_v59 = vpop.f32.mrb[30].mxu1 }
 0x25a   : > { %v1127_v60 = vmul.f32 0.01, %v1091_v56  ;;  %v1094_v61 = vadd.f32 %v2157_v59, %v2643_v51  ;;  %v1085_v62 = vpop.f32.mrb[31].mxu1 }
 0x25b   : > { %v1125_v63 = vmul.f32 0.01, %v1083_v58  ;;  %v1086_v0 = vadd.f32 %v1085_v62, %v2643_v51  ;;  %v2323_v51 = vld [vmem:[%s2880_s3 + $0x28] ss:$16 sps:$4 sm:$0xff]  }
 0x25c   : > { %v1128_v1 = vmul.f32 0.01, %v1094_v61  ;;  %v1159_v3 = vmax.f32 %v1091_v56, %v1127_v60  ;;  %2209 = vmatpush3.bf16.msra.mxu0 %v2323_v51 }
 0x25d   : > { %v1126_v2 = vmul.f32 0.01, %v1086_v0  ;;  %v1157_v5 = vmax.f32 %v1083_v58, %v1125_v63  ;;  %2210 = vmatprep.subr.bf16.mxu0 %v2419_v10 }
 0x25e   : > { %v1160_v4 = vmax.f32 %v1094_v61, %v1128_v1  ;;  %v2337_v1 = vld [vmem:[%s2880_s3 + $0xc] ss:$16 sps:$4 sm:$0xff]  }
 0x25f   : > { %v1158_v6 = vmax.f32 %v1086_v0, %v1126_v2  ;;  %2227 = vmatpush3.bf16.msra.mxu1 %v2337_v1 }
 0x260   : > { %v1176_v7 = vpack.c.bf16 %v1160_v4, %v1159_v3  ;;  %2211 = vmatpush3.bf16.msra.mxu0 %v2325_v11  ;;  %2228 = vmatprep.subr.bf16.mxu1 %v2419_v10 }
 0x261   : > { %v1175_v8 = vpack.c.bf16 %v1158_v6, %v1157_v5  ;;  %2212 = vmatprep.subr.bf16.mxu0 %v2419_v10  ;;  %v2338_v6 = vld [vmem:[%s2880_s3 + $0x2c] ss:$16 sps:$4 sm:$0xff]  }
 0x263   : > { %2202 = vmatprep.mubr.bf16.mxu1 %v1175_v8  ;;  %2229 = vmatpush3.bf16.msra.mxu1 %v2338_v6 }
 0x264   : > { %2203 = vmatmul.mubr.bf16.gmra.mrb[60].mxu1 %v1176_v7  ;;  %2213 = vmatpush3.bf16.msra.mxu0 %v2327_v12 }
 0x265   : > { %2214 = vmatprep.subr.bf16.mxu0 %v2419_v10  ;;  %2242 = vmatprep.mubr.msk.bf16.mxu1 %vm2420_vm1, %v2419_v10 }
 0x266   : > { %2230 = vmatprep.subr.bf16.mxu1 %v2419_v10 }
 0x268   : > { %2215 = vmatpush3.bf16.msra.mxu0 %v2329_v13 }
 0x269   : > { %2216 = vmatprep.subr.bf16.mxu0 %v2419_v10 }
 0x26c   : > { %2217 = vmatpush3.bf16.msra.mxu0 %v2331_v19  ;;  %v2339_v19 = vld [vmem:[%s2880_s3 + $0x4c] ss:$16 sps:$4 sm:$0xff]  }
 0x26d   : > { %2218 = vmatprep.subr.bf16.mxu0 %v2419_v10  ;;  %2231 = vmatpush3.bf16.msra.mxu1 %v2339_v19 }
 0x26e   : > { %2232 = vmatprep.subr.bf16.mxu1 %v2419_v10 }
 0x270   : > { %2219 = vmatpush3.bf16.msra.mxu0 %v2333_v39 }
 0x271   : > { %2220 = vmatprep.subr.bf16.mxu0 %v2419_v10 }
 0x274   : > { %2221 = vmatpush3.bf16.msra.mxu0 %v2335_v42  ;;  %v1595_v42 = vrot.slane %v2737_v47, 3 }
 0x2c7   : > { %v2176_v16 = vpop.f32.mrb[32].mxu1 }
 0x2c8   : > { %v1256_v17 = vadd.f32 %v2176_v16, %v2701_v15  ;;  %v1247_v18 = vpop.f32.mrb[33].mxu1 }
 0x2c9   : > { %v1248_v20 = vadd.f32 %v1247_v18, %v2701_v15  ;;  %v2177_v21 = vpop.f32.mrb[34].mxu1 }
 0x2ca   : > { %v1259_v45 = vadd.f32 %v2177_v21, %v2701_v15  ;;  %v1250_v23 = vpop.f32.mrb[35].mxu1  ;;  %v1376_v24 = vmul.f32 0.01, %v1256_v17 }
 0x2cb   : > { %v1251_v25 = vadd.f32 %v1250_v23, %v2701_v15  ;;  %v1374_v26 = vmul.f32 0.01, %v1248_v20 }
 0x2cc   : > { %v1377_v27 = vmul.f32 0.01, %v1259_v45  ;;  %v1408_v30 = vmax.f32 %v1256_v17, %v1376_v24 }
 0x2cd   : > { %v1375_v28 = vmul.f32 0.01, %v1251_v25  ;;  %v1406_v32 = vmax.f32 %v1248_v20, %v1374_v26 }
 0x2ce   : > { %v1409_v29 = vmax.f32 %v1259_v45, %v1377_v27  ;;  %v2340_v27 = vld [vmem:[%s2880_s3 + $0x6c] ss:$16 sps:$4 sm:$0xff]  }
 0x2cf   : > { %v1407_v31 = vmax.f32 %v1251_v25, %v1375_v28  ;;  %2233 = vmatpush3.bf16.msra.mxu1 %v2340_v27 }
 0x2d0   : > { %v1446_v33 = vsel %vm1442_vm0, %v1409_v29, -inf  ;;  %2234 = vmatprep.subr.bf16.mxu1 %v2419_v10 }
 0x2d1   : > { %v1482_v34 = vmax.f32 %v1408_v30, %v1446_v33  ;;  %v1444_v35 = vsel %vm1442_vm0, %v1407_v31, -inf }
 0x2d2   : > { %v1475_v36 = vmax.f32 %v1406_v32, %v1444_v35 }
 0x2d3   : > { %v1483_v37 = vrot.slane %v1482_v34, 4 }
 0x2d4   : > { %v1476_v40 = vrot.slane %v1475_v36, 4 }
 0x2d5   : > { %v1484_v38 = vmax.f32 %v1482_v34, %v1483_v37 }
 0x2d6   : > { %v1477_v41 = vmax.f32 %v1475_v36, %v1476_v40 }
 0x2d7   : > { %v1485_v44 = vrot.slane %v1484_v38, 2  ;;  %v2180_v48 = vpop.f32.mrb[36].mxu1 }
 0x2d8   : > { %v1478_v49 = vrot.slane %v1477_v41, 2  ;;  %v1272_v50 = vadd.f32 %v2180_v48, %v2701_v15  ;;  %v1263_v46 = vpop.f32.mrb[37].mxu1 }
 0x2d9   : > { %v1486_v52 = vmax.f32 %v1484_v38, %v1485_v44  ;;  %v1264_v53 = vadd.f32 %v1263_v46, %v2701_v15  ;;  %v2181_v54 = vpop.f32.mrb[38].mxu1  ;;  %v2341_v38 = vld [vmem:[%s2880_s3 + $0x8c] ss:$16 sps:$4 sm:$0xff]  }
 0x2da   : > { %v1479_v56 = vmax.f32 %v1477_v41, %v1478_v49  ;;  %v1275_v57 = vadd.f32 %v2181_v54, %v2701_v15  ;;  %v1266_v58 = vpop.f32.mrb[39].mxu1  ;;  %v1380_v60 = vmul.f32 0.01, %v1272_v50  ;;  %2235 = vmatpush3.bf16.msra.mxu1 %v2341_v38 }
 0x2db   : > { %v1487_v59 = vrot.slane %v1486_v52, 1  ;;  %v1378_v61 = vmul.f32 0.01, %v1264_v53  ;;  %v1267_v62 = vadd.f32 %v1266_v58, %v2701_v15  ;;  %2236 = vmatprep.subr.bf16.mxu1 %v2419_v10 }
 0x2dc   : > { %v1480_v63 = vrot.slane %v1479_v56, 1  ;;  %v1381_v0 = vmul.f32 0.01, %v1275_v57  ;;  %v1412_v8 = vmax.f32 %v1272_v50, %v1380_v60  ;;  %v1594_v50 = vrot.slane %v2737_v47, 2 }
 0x2dd   : > { %v1488_v2 = vmax.f32 %v1486_v52, %v1487_v59  ;;  %v1379_v3 = vmul.f32 0.01, %v1267_v62  ;;  %v1410_v11 = vmax.f32 %v1264_v53, %v1378_v61 }
 0x2de   : > { %v1481_v4 = vmax.f32 %v1479_v56, %v1480_v63  ;;  %v1413_v5 = vmax.f32 %v1275_v57, %v1381_v0  ;;  %v2342_v57 = vld [vmem:[%s2880_s3 + $0xac] ss:$16 sps:$4 sm:$0xff]  }
 0x2df   : > { %v1624_v7 = vadd.f32 %v1593_v55, %v1488_v2  ;;  %v1411_v9 = vmax.f32 %v1267_v62, %v1379_v3  ;;  %2237 = vmatpush3.bf16.msra.mxu1 %v2342_v57 }
 0x2e0   : > { %v1623_v51 = vadd.f32 %v2737_v47, %v1481_v4  ;;  %v1450_v12 = vsel %vm1442_vm0, %v1413_v5, -inf  ;;  %v2343_v5 = vld [vmem:[%s2880_s3 + $0xcc] ss:$16 sps:$4 sm:$0xff]   ;;  %2238 = vmatprep.subr.bf16.mxu1 %v2419_v10 }
 0x2e1   : > { %v1640_v13 = vpack.c.bf16 %v1624_v7, %v1624_v7  ;;  %v1496_v14 = vmax.f32 %v1412_v8, %v1450_v12  ;;  %v1448_v16 = vsel %vm1442_vm0, %v1411_v9, -inf }
 0x2e2   : > { %v1639_v17 = vpack.c.bf16 %v1623_v51, %v1623_v51  ;;  %v1489_v18 = vmax.f32 %v1410_v11, %v1448_v16 }
 0x2e3   : > { %v1676_v20 = vunpack.c.l.b16 %v1640_v13  ;;  %v1497_v21 = vrot.slane %v1496_v14, 4  ;;  %2239 = vmatpush3.bf16.msra.mxu1 %v2343_v5 }
 0x2e4   : > { %v1675_v45 = vunpack.c.l.b16 %v1639_v17  ;;  %v1490_v23 = vrot.slane %v1489_v18, 4  ;;  %2240 = vmatprep.subr.bf16.mxu1 %v2419_v10 }
 0x2e5   : > { %v1691_v24 = vrot.slane %v1676_v20, 7  ;;  %v1498_v25 = vmax.f32 %v1496_v14, %v1497_v21 }
 0x2e6   : > { %v1491_v26 = vmax.f32 %v1489_v18, %v1490_v23 }
 0x2e7   : > { %v1693_v28 = vsel %vm1692_vm2, %v1691_v24, %v1675_v45  ;;  %v1499_v29 = vrot.slane %v1498_v25, 2  ;;  %v2184_v30 = vpop.f32.mrb[40].mxu1 }
 0x2e8   : > { %v1492_v31 = vrot.slane %v1491_v26, 2  ;;  %v1288_v32 = vadd.f32 %v2184_v30, %v2701_v15  ;;  %v1279_v33 = vpop.f32.mrb[41].mxu1  ;;  %v1597_v30 = vrot.slane %v2737_v47, 5 }
 0x2e9   : > { %v1500_v34 = vmax.f32 %v1498_v25, %v1499_v29  ;;  %v1280_v35 = vadd.f32 %v1279_v33, %v2701_v15  ;;  %v2185_v36 = vpop.f32.mrb[42].mxu1 }
 0x2ea   : > { %v1493_v37 = vmax.f32 %v1491_v26, %v1492_v31  ;;  %v1291_v39 = vadd.f32 %v2185_v36, %v2701_v15  ;;  %v1282_v40 = vpop.f32.mrb[43].mxu1  ;;  %v1384_v44 = vmul.f32 0.01, %v1288_v32 }
 0x2eb   : > { %v1501_v41 = vrot.slane %v1500_v34, 1  ;;  %v1283_v48 = vadd.f32 %v1282_v40, %v2701_v15  ;;  %v1382_v46 = vmul.f32 0.01, %v1280_v35 }
 0x2ec   : > { %v1494_v49 = vrot.slane %v1493_v37, 1  ;;  %v1385_v52 = vmul.f32 0.01, %v1291_v39  ;;  %v1416_v59 = vmax.f32 %v1288_v32, %v1384_v44  ;;  %v1596_v32 = vrot.slane %v2737_v47, 4 }
 0x2ed   : > { %v1502_v53 = vmax.f32 %v1500_v34, %v1501_v41  ;;  %v1383_v54 = vmul.f32 0.01, %v1283_v48  ;;  %v1414_v62 = vmax.f32 %v1280_v35, %v1382_v46 }
 0x2ee   : > { %v1495_v55 = vmax.f32 %v1493_v37, %v1494_v49  ;;  %v1417_v56 = vmax.f32 %v1291_v39, %v1385_v52 }
 0x2ef   : > { %v1626_v58 = vadd.f32 %v1595_v42, %v1502_v53  ;;  %v1415_v60 = vmax.f32 %v1283_v48, %v1383_v54 }
 0x2f0   : > { %v1625_v61 = vadd.f32 %v1594_v50, %v1495_v55  ;;  %v1454_v63 = vsel %vm1442_vm0, %v1417_v56, -inf }
 0x2f1   : > { %v1642_v0 = vpack.c.bf16 %v1626_v58, %v1626_v58  ;;  %v1510_v1 = vmax.f32 %v1416_v59, %v1454_v63  ;;  %v1452_v2 = vsel %vm1442_vm0, %v1415_v60, -inf }
 0x2f2   : > { %v1641_v3 = vpack.c.bf16 %v1625_v61, %v1625_v61  ;;  %v1503_v4 = vmax.f32 %v1414_v62, %v1452_v2 }
 0x2f3   : > { %v1678_v6 = vunpack.c.l.b16 %v1642_v0  ;;  %v1511_v7 = vrot.slane %v1510_v1, 4 }
 0x2f4   : > { %v1677_v8 = vunpack.c.l.b16 %v1641_v3  ;;  %v1504_v9 = vrot.slane %v1503_v4, 4 }
 0x2f5   : > { %v1512_v51 = vmax.f32 %v1510_v1, %v1511_v7  ;;  %v1697_v13 = vrot.slane %v1678_v6, 5 }
 0x2f6   : > { %v1694_v11 = vrot.slane %v1677_v8, 6  ;;  %v1505_v12 = vmax.f32 %v1503_v4, %v1504_v9 }
 0x2f7   : > { %v1513_v14 = vrot.slane %v1512_v51, 2  ;;  %v2188_v16 = vpop.f32.mrb[44].mxu1 }
 0x2f8   : > { %v1696_v17 = vsel %vm1695_vm3, %v1694_v11, %v1693_v28  ;;  %v1506_v18 = vrot.slane %v1505_v12, 2  ;;  %v1304_v19 = vadd.f32 %v2188_v16, %v2701_v15  ;;  %v1295_v20 = vpop.f32.mrb[45].mxu1 }
 0x2f9   : > { %v1514_v21 = vmax.f32 %v1512_v51, %v1513_v14  ;;  %v1699_v45 = vsel %vm1698_vm4, %v1697_v13, %v1696_v17  ;;  %v1296_v23 = vadd.f32 %v1295_v20, %v2701_v15  ;;  %v2189_v24 = vpop.f32.mrb[46].mxu1  ;;  %v1598_v17 = vrot.slane %v2737_v47, 6 }
 0x2fa   : > { %v1507_v25 = vmax.f32 %v1505_v12, %v1506_v18  ;;  %v1307_v26 = vadd.f32 %v2189_v24, %v2701_v15  ;;  %v1298_v27 = vpop.f32.mrb[47].mxu1  ;;  %v1388_v10 = vmul.f32 0.01, %v1304_v19  ;;  %v1599_v12 = vrot.slane %v2737_v47, 7 }
 0x2fb   : > { %v1515_v29 = vrot.slane %v1514_v21, 1  ;;  %v1299_v28 = vadd.f32 %v1298_v27, %v2701_v15  ;;  %v1386_v33 = vmul.f32 0.01, %v1296_v23 }
 0x2fc   : > { %v1508_v31 = vrot.slane %v1507_v25, 1  ;;  %v1389_v34 = vmul.f32 0.01, %v1307_v26  ;;  %v1420_v38 = vmax.f32 %v1304_v19, %v1388_v10 }
 0x2fd   : > { %v1516_v35 = vmax.f32 %v1514_v21, %v1515_v29  ;;  %v1387_v36 = vmul.f32 0.01, %v1299_v28  ;;  %v1418_v44 = vmax.f32 %v1296_v23, %v1386_v33 }
 0x2fe   : > { %v1509_v37 = vmax.f32 %v1507_v25, %v1508_v31  ;;  %v1421_v39 = vmax.f32 %v1307_v26, %v1389_v34 }
 0x2ff   : > { %v1628_v40 = vadd.f32 %v1597_v30, %v1516_v35  ;;  %v1419_v41 = vmax.f32 %v1299_v28, %v1387_v36 }
 0x300   : > { %v1627_v42 = vadd.f32 %v1596_v32, %v1509_v37  ;;  %v1458_v48 = vsel %vm1442_vm0, %v1421_v39, -inf }
 0x301   : > { %v1644_v49 = vpack.c.bf16 %v1628_v40, %v1628_v40  ;;  %v1524_v50 = vmax.f32 %v1420_v38, %v1458_v48  ;;  %v1456_v46 = vsel %vm1442_vm0, %v1419_v41, -inf }
 0x302   : > { %v1643_v52 = vpack.c.bf16 %v1627_v42, %v1627_v42  ;;  %v1517_v53 = vmax.f32 %v1418_v44, %v1456_v46  ;;  %v2815_v44 = vld [vmem:[%s2730_s15 + $0x10] sm:$0xff] }
 0x303   : > { %v1680_v54 = vunpack.c.l.b16 %v1644_v49  ;;  %v1525_v55 = vrot.slane %v1524_v50, 4 }
 0x304   : > { %v1679_v56 = vunpack.c.l.b16 %v1643_v52  ;;  %v1518_v57 = vrot.slane %v1517_v53, 4 }
 0x305   : > { %v1526_v58 = vmax.f32 %v1524_v50, %v1525_v55  ;;  %v1703_v61 = vrot.slane %v1680_v54, 3 }
 0x306   : > { %v1700_v59 = vrot.slane %v1679_v56, 4  ;;  %v1519_v60 = vmax.f32 %v1517_v53, %v1518_v57 }
 0x307   : > { %v1527_v62 = vrot.slane %v1526_v58, 2  ;;  %v2192_v63 = vpop.f32.mrb[48].mxu1 }
 0x308   : > { %v1702_v0 = vsel %vm1701_vm5, %v1700_v59, %v1699_v45  ;;  %v1520_v1 = vrot.slane %v1519_v60, 2  ;;  %v1320_v2 = vadd.f32 %v2192_v63, %v2701_v15  ;;  %v1311_v3 = vpop.f32.mrb[49].mxu1 }
 0x309   : > { %v1528_v4 = vmax.f32 %v1526_v58, %v1527_v62  ;;  %v1312_v5 = vadd.f32 %v1311_v3, %v2701_v15  ;;  %v2193_v6 = vpop.f32.mrb[50].mxu1  ;;  %v1705_v7 = vsel %vm1704_vm6, %v1703_v61, %v1702_v0 }
 0x30a   : > { %v1521_v8 = vmax.f32 %v1519_v60, %v1520_v1  ;;  %v1323_v9 = vadd.f32 %v2193_v6, %v2701_v15  ;;  %v1314_v51 = vpop.f32.mrb[51].mxu1  ;;  %v1392_v13 = vmul.f32 0.01, %v1320_v2  ;;  %v1600_v60 = vrot.slane %v2815_v44, 1 }
 0x30b   : > { %v1529_v11 = vrot.slane %v1528_v4, 1  ;;  %v1315_v14 = vadd.f32 %v1314_v51, %v2701_v15  ;;  %v1390_v18 = vmul.f32 0.01, %v1312_v5 }
 0x30c   : > { %v1522_v16 = vrot.slane %v1521_v8, 1  ;;  %v1393_v19 = vmul.f32 0.01, %v1323_v9  ;;  %v1424_v25 = vmax.f32 %v1320_v2, %v1392_v13 }
 0x30d   : > { %v1530_v20 = vmax.f32 %v1528_v4, %v1529_v11  ;;  %v1391_v21 = vmul.f32 0.01, %v1315_v14  ;;  %v1422_v29 = vmax.f32 %v1312_v5, %v1390_v18 }
 0x30e   : > { %v1523_v45 = vmax.f32 %v1521_v8, %v1522_v16  ;;  %v1425_v23 = vmax.f32 %v1323_v9, %v1393_v19 }
 0x30f   : > { %v1630_v24 = vadd.f32 %v1599_v12, %v1530_v20  ;;  %v1423_v26 = vmax.f32 %v1315_v14, %v1391_v21 }
 0x310   : > { %v1629_v27 = vadd.f32 %v1598_v17, %v1523_v45  ;;  %v1462_v30 = vsel %vm1442_vm0, %v1425_v23, -inf }
 0x311   : > { %v1646_v10 = vpack.c.bf16 %v1630_v24, %v1630_v24  ;;  %v1538_v28 = vmax.f32 %v1424_v25, %v1462_v30  ;;  %v1460_v47 = vsel %vm1442_vm0, %v1423_v26, -inf }
 0x312   : > { %v1645_v31 = vpack.c.bf16 %v1629_v27, %v1629_v27  ;;  %v1531_v32 = vmax.f32 %v1422_v29, %v1460_v47 }
 0x313   : > { %v1682_v33 = vunpack.c.l.b16 %v1646_v10  ;;  %v1539_v34 = vrot.slane %v1538_v28, 4 }
 0x314   : > { %v1681_v35 = vunpack.c.l.b16 %v1645_v31  ;;  %v1532_v36 = vrot.slane %v1531_v32, 4 }
 0x315   : > { %v1540_v37 = vmax.f32 %v1538_v28, %v1539_v34  ;;  %v1709_v38 = vrot.slane %v1682_v33, 1 }
 0x316   : > { %v1706_v39 = vrot.slane %v1681_v35, 2  ;;  %v1533_v40 = vmax.f32 %v1531_v32, %v1532_v36  ;;  %v1602_v36 = vrot.slane %v2815_v44, 3 }
 0x317   : > { %v1541_v41 = vrot.slane %v1540_v37, 2  ;;  %v2196_v42 = vpop.f32.mrb[52].mxu1 }
 0x318   : > { %v1534_v48 = vrot.slane %v1533_v40, 2  ;;  %v1336_v49 = vadd.f32 %v2196_v42, %v2701_v15  ;;  %v1327_v50 = vpop.f32.mrb[53].mxu1  ;;  %v1708_v46 = vsel %vm1707_vm7, %v1706_v39, %v1705_v7 }
 0x319   : > { %v1542_v52 = vmax.f32 %v1540_v37, %v1541_v41  ;;  %v1328_v53 = vadd.f32 %v1327_v50, %v2701_v15  ;;  %v2197_v54 = vpop.f32.mrb[54].mxu1  ;;  %v2821_v55 = vsel %vm1710_vm8, %v1709_v38, %v1708_v46  ;;  %v1601_v38 = vrot.slane %v2815_v44, 2 }
 0x31a   : > { %v1535_v56 = vmax.f32 %v1533_v40, %v1534_v48  ;;  %v1339_v57 = vadd.f32 %v2197_v54, %v2701_v15  ;;  %v1330_v58 = vpop.f32.mrb[55].mxu1  ;;  %v1396_v61 = vmul.f32 0.01, %v1336_v49 }
 0x31b   : > { %v1543_v59 = vrot.slane %v1542_v52, 1  ;;  %v1331_v62 = vadd.f32 %v1330_v58, %v2701_v15  ;;  %v1394_v0 = vmul.f32 0.01, %v1328_v53 }
 0x31c   : > { %v1536_v63 = vrot.slane %v1535_v56, 1  ;;  %v1397_v1 = vmul.f32 0.01, %v1339_v57  ;;  %v1428_v7 = vmax.f32 %v1336_v49, %v1396_v61 }
 0x31d   : > { %v1544_v2 = vmax.f32 %v1542_v52, %v1543_v59  ;;  %v1395_v3 = vmul.f32 0.01, %v1331_v62  ;;  %v1426_v51 = vmax.f32 %v1328_v53, %v1394_v0 }
 0x31e   : > { %v1537_v4 = vmax.f32 %v1535_v56, %v1536_v63  ;;  %v1429_v5 = vmax.f32 %v1339_v57, %v1397_v1 }
 0x31f   : > { %v1632_v6 = vadd.f32 %v1600_v60, %v1544_v2  ;;  %v1427_v8 = vmax.f32 %v1331_v62, %v1395_v3 }
 0x320   : > { %v1631_v9 = vadd.f32 %v2815_v44, %v1537_v4  ;;  %v1466_v11 = vsel %vm1442_vm0, %v1429_v5, -inf }
 0x321   : > { %v1648_v12 = vpack.c.bf16 %v1632_v6, %v1632_v6  ;;  %v1552_v13 = vmax.f32 %v1428_v7, %v1466_v11  ;;  %v1464_v14 = vsel %vm1442_vm0, %v1427_v8, -inf }
 0x322   : > { %v1647_v16 = vpack.c.bf16 %v1631_v9, %v1631_v9  ;;  %v1545_v17 = vmax.f32 %v1426_v51, %v1464_v14 }
 0x323   : > { %v1684_v18 = vunpack.c.l.b16 %v1648_v12  ;;  %v1553_v19 = vrot.slane %v1552_v13, 4 }
 0x324   : > { %v1683_v20 = vunpack.c.l.b16 %v1647_v16  ;;  %v1546_v21 = vrot.slane %v1545_v17, 4 }
 0x325   : > { %v1712_v45 = vrot.slane %v1684_v18, 7  ;;  %v1554_v23 = vmax.f32 %v1552_v13, %v1553_v19 }
 0x326   : > { %v1547_v24 = vmax.f32 %v1545_v17, %v1546_v21 }
 0x327   : > { %v1713_v25 = vsel %vm1692_vm2, %v1712_v45, %v1683_v20  ;;  %v1555_v26 = vrot.slane %v1554_v23, 2  ;;  %v2200_v27 = vpop.f32.mrb[56].mxu1 }
 0x328   : > { %v1548_v29 = vrot.slane %v1547_v24, 2  ;;  %v1352_v30 = vadd.f32 %v2200_v27, %v2701_v15  ;;  %v1343_v10 = vpop.f32.mrb[57].mxu1  ;;  %v1603_v27 = vrot.slane %v2815_v44, 4 }
 0x329   : > { %v1556_v28 = vmax.f32 %v1554_v23, %v1555_v26  ;;  %v1344_v47 = vadd.f32 %v1343_v10, %v2701_v15  ;;  %v2201_v31 = vpop.f32.mrb[58].mxu1  ;;  %v1604_v23 = vrot.slane %v2815_v44, 5 }
 0x32a   : > { %v1549_v32 = vmax.f32 %v1547_v24, %v1548_v29  ;;  %v1355_v33 = vadd.f32 %v2201_v31, %v2701_v15  ;;  %v1346_v34 = vpop.f32.mrb[59].mxu1  ;;  %v1400_v37 = vmul.f32 0.01, %v1352_v30 }
 0x32b   : > { %v1557_v35 = vrot.slane %v1556_v28, 1  ;;  %v1347_v39 = vadd.f32 %v1346_v34, %v2701_v15  ;;  %v1398_v41 = vmul.f32 0.01, %v1344_v47 }
 0x32c   : > { %v1550_v40 = vrot.slane %v1549_v32, 1  ;;  %v1401_v42 = vmul.f32 0.01, %v1355_v33  ;;  %v1432_v53 = vmax.f32 %v1352_v30, %v1400_v37 }
 0x32d   : > { %v1558_v48 = vmax.f32 %v1556_v28, %v1557_v35  ;;  %v1399_v49 = vmul.f32 0.01, %v1347_v39  ;;  %v1430_v57 = vmax.f32 %v1344_v47, %v1398_v41 }
 0x32e   : > { %v1551_v50 = vmax.f32 %v1549_v32, %v1550_v40  ;;  %v1433_v46 = vmax.f32 %v1355_v33, %v1401_v42 }
 0x32f   : > { %v1634_v52 = vadd.f32 %v1602_v36, %v1558_v48  ;;  %v1431_v54 = vmax.f32 %v1347_v39, %v1399_v49 }
 0x330   : > { %v1633_v56 = vadd.f32 %v1601_v38, %v1551_v50  ;;  %v1470_v58 = vsel %vm1442_vm0, %v1433_v46, -inf }
 0x331   : > { %v1650_v59 = vpack.c.bf16 %v1634_v52, %v1634_v52  ;;  %v1566_v60 = vmax.f32 %v1432_v53, %v1470_v58  ;;  %v1468_v61 = vsel %vm1442_vm0, %v1431_v54, -inf }
 0x332   : > { %v1649_v62 = vpack.c.bf16 %v1633_v56, %v1633_v56  ;;  %v1559_v63 = vmax.f32 %v1430_v57, %v1468_v61 }
 0x333   : > { %v1686_v0 = vunpack.c.l.b16 %v1650_v59  ;;  %v1567_v1 = vrot.slane %v1566_v60, 4 }
 0x334   : > { %v1685_v2 = vunpack.c.l.b16 %v1649_v62  ;;  %v1560_v3 = vrot.slane %v1559_v63, 4  ;;  %v1606_v62 = vrot.slane %v2815_v44, 7 }
 0x335   : > { %v1568_v4 = vmax.f32 %v1566_v60, %v1567_v1  ;;  %v1716_v7 = vrot.slane %v1686_v0, 5  ;;  %v1605_v0 = vrot.slane %v2815_v44, 6  ;;  %v2344_v44 = vld [vmem:[%s2880_s3 + $0xec] ss:$16 sps:$4 sm:$0xff]  }
 0x336   : > { %v1714_v5 = vrot.slane %v1685_v2, 6  ;;  %v1561_v6 = vmax.f32 %v1559_v63, %v1560_v3  ;;  %2241 = vmatpush3.bf16.msra.mxu1 %v2344_v44 }
 0x337   : > { %v1569_v8 = vrot.slane %v1568_v4, 2  ;;  %v2204_v9 = vpop.f32.mrb[60].mxu1 }
 0x338   : > { %v1715_v51 = vsel %vm1695_vm3, %v1714_v5, %v1713_v25  ;;  %v1562_v11 = vrot.slane %v1561_v6, 2  ;;  %v1368_v12 = vadd.f32 %v2204_v9, %v2701_v15  ;;  %v1359_v13 = vpop.f32.mrb[61].mxu1 }
 0x339   : > { %v1570_v14 = vmax.f32 %v1568_v4, %v1569_v8  ;;  %v1717_v16 = vsel %vm1698_vm4, %v1716_v7, %v1715_v51  ;;  %v1360_v17 = vadd.f32 %v1359_v13, %v2701_v15  ;;  %v2205_v18 = vpop.f32.mrb[62].mxu1 }
 0x33a   : > { %v1563_v19 = vmax.f32 %v1561_v6, %v1562_v11  ;;  %v1371_v20 = vadd.f32 %v2205_v18, %v2701_v15  ;;  %v1362_v21 = vpop.f32.mrb[63].mxu1  ;;  %v1404_v24 = vmul.f32 0.01, %v1368_v12 }
 0x33b   : > { %v1571_v45 = vrot.slane %v1570_v14, 1  ;;  %v1363_v25 = vadd.f32 %v1362_v21, %v2701_v15  ;;  %v1402_v29 = vmul.f32 0.01, %v1360_v17 }
 0x33c   : > { %v1564_v26 = vrot.slane %v1563_v19, 1  ;;  %v1405_v30 = vmul.f32 0.01, %v1371_v20  ;;  %v1436_v33 = vmax.f32 %v1368_v12, %v1404_v24 }
 0x33d   : > { %v1572_v10 = vmax.f32 %v1570_v14, %v1571_v45  ;;  %v1403_v28 = vmul.f32 0.01, %v1363_v25  ;;  %v1434_v36 = vmax.f32 %v1360_v17, %v1402_v29  ;;  %v1657_v14 = vsub.s32 3, %v2576_v43  ;;  %v1588_v43 = vld [vmem:[%s2730_s15 + $0x8] sm:$0xff] }
 0x33e   : > { %v1565_v47 = vmax.f32 %v1563_v19, %v1564_v26  ;;  %v1437_v31 = vmax.f32 %v1371_v20, %v1405_v30  ;;  %v1590_v30 = vld [vmem:[%s2730_s15 + $0x18] sm:$0xff] }
 0x33f   : > { %v1636_v32 = vadd.f32 %v1604_v23, %v1572_v10  ;;  %v1435_v34 = vmax.f32 %v1363_v25, %v1403_v28 }
 0x340   : > { %v1635_v35 = vadd.f32 %v1603_v27, %v1565_v47  ;;  %v1474_v37 = vsel %vm1442_vm0, %v1437_v31, -inf }
 0x341   : > { %v1652_v39 = vpack.c.bf16 %v1636_v32, %v1636_v32  ;;  %v1580_v40 = vmax.f32 %v1436_v33, %v1474_v37  ;;  %v1472_v15 = vsel %vm1442_vm0, %v1435_v34, -inf }
 0x342   : > { %v1651_v38 = vpack.c.bf16 %v1635_v35, %v1635_v35  ;;  %v1573_v41 = vmax.f32 %v1434_v36, %v1472_v15 }
 0x343   : > { %v1688_v42 = vunpack.c.l.b16 %v1652_v39  ;;  %v1581_v48 = vrot.slane %v1580_v40, 4 }
 0x344   : > { %v1687_v49 = vunpack.c.l.b16 %v1651_v38  ;;  %v1574_v50 = vrot.slane %v1573_v41, 4 }
 0x345   : > { %v1582_v46 = vmax.f32 %v1580_v40, %v1581_v48  ;;  %v1720_v54 = vrot.slane %v1688_v42, 3 }
 0x346   : > { %v1718_v52 = vrot.slane %v1687_v49, 4  ;;  %v1575_v53 = vmax.f32 %v1573_v41, %v1574_v50 }
 0x347   : > { %v1583_v56 = vrot.slane %v1582_v46, 2 }
 0x348   : > { %v1719_v57 = vsel %vm1701_vm5, %v1718_v52, %v1717_v16  ;;  %v1576_v58 = vrot.slane %v1575_v53, 2  ;;  %v2409_v16 = vld [vmem:[%s2881_s4] sm:$0xff] }
 0x349   : > { %v1584_v59 = vmax.f32 %v1582_v46, %v1583_v56  ;;  %v1721_v60 = vsel %vm1704_vm6, %v1720_v54, %v1719_v57  ;;  %v1658_v17 = vrot.slane %v2409_v16, %v1657_v14 }
 0x34a   : > { %v1577_v61 = vmax.f32 %v1575_v53, %v1576_v58 }
 0x34b   : > { %v1585_v22 = vrot.slane %v1584_v59, 1 }
 0x34c   : > { %v1578_v63 = vrot.slane %v1577_v61, 1 }
 0x34d   : > { %v1586_v1 = vmax.f32 %v1584_v59, %v1585_v22 }
 0x34e   : > { %v1579_v2 = vmax.f32 %v1577_v61, %v1578_v63 }
 0x34f   : > { %v1638_v3 = vadd.f32 %v1606_v62, %v1586_v1 }
 0x350   : > { %v1637_v4 = vadd.f32 %v1605_v0, %v1579_v2 }
 0x351   : > { %v1654_v5 = vpack.c.bf16 %v1638_v3, %v1638_v3 }
 0x352   : > { %v1653_v6 = vpack.c.bf16 %v1637_v4, %v1637_v4 }
 0x353   : > { %v1690_v7 = vunpack.c.l.b16 %v1654_v5 }
 0x354   : > { %v1689_v8 = vunpack.c.l.b16 %v1653_v6 }
 0x355   : > { %v1724_v51 = vrot.slane %v1690_v7, 1 }
 0x356   : > { %v1722_v9 = vrot.slane %v1689_v8, 2 }
 0x358   : > { %v1723_v11 = vsel %vm1707_vm7, %v1722_v9, %v1721_v60 }
 0x359   : > { %v1725_v12 = vsel %vm1710_vm8, %v1724_v51, %v1723_v11 }
 0x35a   : > { %v1726_v13 = vpack.c.b16 %v1725_v12, %v2821_v55 }
 0x35c   : > { %2223 = vmatmul.mubr.bf16.vlgmr.msra.gmra.mrb[64].mxu0 %v1726_v13 }
 0x42f   : > { %v1810_v18 = vpop.f32.mrb[64].mxu0 }
 0x430   : > { %v1811_v19 = vadd.f32 %v1810_v18, %v1658_v17  ;;  %v2224_v20 = vpop.f32.mrb[65].mxu0 }
 0x431   : > { %v1813_v55 = vpop.f32.mrb[66].mxu0 }
 0x432   : > { %v1817_v21 = vmul.f32 0.01, %v1811_v19  ;;  %v1814_v45 = vadd.f32 %v1813_v55, %v1658_v17  ;;  %v2225_v23 = vpop.f32.mrb[67].mxu0 }
 0x434   : > { %v1818_v24 = vmul.f32 0.01, %v1814_v45  ;;  %v1819_v25 = vmax.f32 %v1811_v19, %v1817_v21 }
 0x436   : > { %v1820_v26 = vmax.f32 %v1814_v45, %v1818_v24 }
 0x438   : > { %v1821_v27 = vpack.c.bf16 %v1820_v26, %v1819_v25 }
 0x43a   : > { %2243 = vmatmul.mubr.bf16.vlgmr.msra.gmra.mrb[64].mxu1 %v1821_v27 }
 0x50d   : > { %v1888_v29 = vpop.f32.mrb[64].mxu1 }
 0x50e   : > { %v1889_v10 = vadd.f32 %v1888_v29, %v1588_v43  ;;  %v2244_v28 = vpop.f32.mrb[65].mxu1 }
 0x50f   : > { %v1891_v47 = vpop.f32.mrb[66].mxu1 }
 0x510   : > { %1895 = vst [vmem:[%s251_s17] sm:$0xff] %v1889_v10  ;;  %v1892_v31 = vadd.f32 %v1891_v47, %v1590_v30  ;;  %v2245_v32 = vpop.f32.mrb[67].mxu1 }
 0x512   : > { %1896 = vst [vmem:[%s251_s17 + $0x8] sm:$0xff] %v1892_v31 }
 0x513 PF: > { %s15_s18 = sadd.s32 1, %s2416_s18  }
 0x514   : > { %p12_p5 = scmp.ge.s32.totalorder %s15_s18, 4  }
 0x516   :  { %14 = sbr.rel (!%p12_p5) target bundleno = 1 (0x1), region = 73 }

</bundles_post_ra>
